<compile_context>
chip_gen: v7x
topology: tpu7x:2x2x1
jax: 0.10.0
libtpu: 0.0.40
codegen_flags: <defaults>
</compile_context>

<pallas_src>
import functools
import math

import jax
import jax.numpy as jnp
from jax import lax
from jax.experimental import pallas as pl
from jax.experimental.pallas import tpu as pltpu


# ---------------------------------------------------------------------------
# Fused kernel: one batch element per grid step.
#   q/k/v blocks: (1, N, D); weights (D, D); biases (1, D); out (1, Nq, D)
# ---------------------------------------------------------------------------
def _mha_fused_kernel(q_ref, k_ref, v_ref,
                      wq_ref, bq_ref, wk_ref, bk_ref, wv_ref, bv_ref,
                      wm_ref, bm_ref, o_ref, *, head, head_size):
    f32 = jnp.float32
    q = q_ref[0]                                            # (Nq, D)
    k = k_ref[0]                                            # (Nk, D)
    v = v_ref[0]                                            # (Nk, D)

    # Q / K / V projections (weights resident in VMEM across the grid).
    qp = jnp.dot(q, wq_ref[...], preferred_element_type=f32) + bq_ref[...]
    kp = jnp.dot(k, wk_ref[...], preferred_element_type=f32) + bk_ref[...]
    vp = jnp.dot(v, wv_ref[...], preferred_element_type=f32) + bv_ref[...]

    scale = 1.0 / math.sqrt(head_size)
    outs = []
    for h in range(head):                                   # static unroll, tiny H
        lo = h * head_size
        qh = qp[:, lo:lo + head_size]                       # (Nq, Hs) static lane slice
        kh = kp[:, lo:lo + head_size]                       # (Nk, Hs)
        vh = vp[:, lo:lo + head_size]                       # (Nk, Hs)
        # scores = qh @ kh^T without materializing a transpose.
        scores = lax.dot_general(qh, kh, (((1,), (1,)), ((), ())),
                                 preferred_element_type=f32) * scale
        # numerically-stable softmax along the key axis (F.softmax(dim=-1))
        m = jnp.max(scores, axis=-1, keepdims=True)
        e = jnp.exp(scores - m)
        denom = jnp.sum(e, axis=-1, keepdims=True)
        p = e * pl.reciprocal(denom, approx=True)           # EUP slot, ~free
        outs.append(jnp.dot(p, vh, preferred_element_type=f32))   # (Nq, Hs)

    att = jnp.concatenate(outs, axis=-1)                    # (Nq, D) lane-dense
    out = jnp.dot(att, wm_ref[...], preferred_element_type=f32) + bm_ref[...]
    o_ref[0] = out.astype(o_ref.dtype)


# ---------------------------------------------------------------------------
# Parameters (weights stored as (in, out) == PyTorch weight transposed).
# ---------------------------------------------------------------------------
class MHAttDctParams:
    def __init__(self, key, hidden_dim=640, head=8, dtype=jnp.float32):
        self.hidden_dim = hidden_dim
        self.head = head
        self.head_size = hidden_dim // 8           # int(hidden_dim / 8), as in ref
        assert self.head * self.head_size == hidden_dim, \
            "head * head_size must equal hidden_dim (reference assumes head == 8)"
        ks = jax.random.split(key, 8)
        sc = 1.0 / math.sqrt(hidden_dim)

        def w(k):
            return (jax.random.normal(k, (hidden_dim, hidden_dim)) * sc).astype(dtype)

        def b(k):
            return (jax.random.normal(k, (1, hidden_dim)) * sc).astype(dtype)

        self.wv, self.bv = w(ks[0]), b(ks[1])
        self.wk, self.bk = w(ks[2]), b(ks[3])
        self.wq, self.bq = w(ks[4]), b(ks[5])
        self.wm, self.bm = w(ks[6]), b(ks[7])


# ---------------------------------------------------------------------------
# Forward wrapper: single pallas_call, grid over batch.
# ---------------------------------------------------------------------------
def mhatt_dct_forward(params, v, k, q, mask=None):
    """v, k: (b, nk, hidden); q: (b, nq, hidden) -> (b, nq, hidden)."""
    assert mask is None  # TODO(synk): mask path (masked_fill -65504.0) not implemented
    b, nq, s = q.shape
    nk = k.shape[1]
    assert v.shape[1] == nk
    H, Hs, D = params.head, params.head_size, params.hidden_dim
    assert s == D and H * Hs == D

    kernel = functools.partial(_mha_fused_kernel, head=H, head_size=Hs)

    q_spec = pl.BlockSpec((1, nq, D), lambda i: (i, 0, 0))
    kv_spec = pl.BlockSpec((1, nk, D), lambda i: (i, 0, 0))
    w_spec = pl.BlockSpec((D, D), lambda i: (0, 0))      # resident across grid
    bias_spec = pl.BlockSpec((1, D), lambda i: (0, 0))   # resident across grid

    return pl.pallas_call(
        kernel,
        out_shape=jax.ShapeDtypeStruct((b, nq, D), q.dtype),
        grid=(b,),
        in_specs=[q_spec, kv_spec, kv_spec,
                  w_spec, bias_spec,      # wq, bq
                  w_spec, bias_spec,      # wk, bk
                  w_spec, bias_spec,      # wv, bv
                  w_spec, bias_spec],     # wm, bm
        out_specs=pl.BlockSpec((1, nq, D), lambda i: (i, 0, 0)),
        compiler_params=pltpu.CompilerParams(
            dimension_semantics=("parallel",)),
    )(q, k, v,
      params.wq, params.bq, params.wk, params.bk,
      params.wv, params.bv, params.wm, params.bm)


# ---------------------------------------------------------------------------
# Plain-JAX reference for a correctness sanity check.
# ---------------------------------------------------------------------------
def _reference(params, v, k, q):
    b, nq, s = q.shape
    H, Hs, D = params.head, params.head_size, params.hidden_dim

    def proj(x, w, bias):
        y = x.reshape(-1, s) @ w + bias
        return y.reshape(b, -1, H, Hs).transpose(0, 2, 1, 3)

    vh = proj(v, params.wv, params.bv)
    kh = proj(k, params.wk, params.bk)
    qh = proj(q, params.wq, params.bq)
    scores = jnp.einsum("bhqd,bhkd->bhqk", qh, kh) / math.sqrt(Hs)
    p = jax.nn.softmax(scores, axis=-1)
    att = jnp.einsum("bhqk,bhkd->bhqd", p, vh)
    att = att.transpose(0, 2, 1, 3).reshape(b, nq, D)
    return (att.reshape(-1, D) @ params.wm + params.bm).reshape(b, nq, D)


if __name__ == "__main__":
    key = jax.random.PRNGKey(0)
    kp, kv, kk, kq = jax.random.split(key, 4)

    # head=8 -> head_size=16; hidden=128 keeps the output minor dim lane-dense.
    batch, seq, hidden = 2, 16, 128
    params = MHAttDctParams(kp, hidden_dim=hidden, head=8)

    v = jax.random.normal(kv, (batch, seq, hidden), dtype=jnp.float32)
    k = jax.random.normal(kk, (batch, seq, hidden), dtype=jnp.float32)
    q = jax.random.normal(kq, (batch, seq, hidden), dtype=jnp.float32)

    out = jax.block_until_ready(mhatt_dct_forward(params, v, k, q))

    ref = _reference(params, v, k, q)
    assert out.shape == (batch, seq, hidden)
    # approx=True reciprocal -> allow a slightly looser tolerance
    err = float(jnp.max(jnp.abs(out - ref)))
    assert jnp.allclose(out, ref, atol=5e-3, rtol=5e-3), \
        f"mismatch vs reference (max abs err {err})"
    print("KERNEL_OK")
</pallas_src>

<mosaic_0001>
module attributes {stable_mosaic.version = 11 : i64} {
  func.func @_mha_fused_kernel(%arg0: i32, %arg1: memref<1x16x128xf32, #tpu.memory_space<vmem>>, %arg2: memref<1x16x128xf32, #tpu.memory_space<vmem>>, %arg3: memref<1x16x128xf32, #tpu.memory_space<vmem>>, %arg4: memref<128x128xf32, #tpu.memory_space<vmem>>, %arg5: memref<1x128xf32, #tpu.memory_space<vmem>>, %arg6: memref<128x128xf32, #tpu.memory_space<vmem>>, %arg7: memref<1x128xf32, #tpu.memory_space<vmem>>, %arg8: memref<128x128xf32, #tpu.memory_space<vmem>>, %arg9: memref<1x128xf32, #tpu.memory_space<vmem>>, %arg10: memref<128x128xf32, #tpu.memory_space<vmem>>, %arg11: memref<1x128xf32, #tpu.memory_space<vmem>>, %arg12: memref<1x16x128xf32, #tpu.memory_space<vmem>>) attributes {dimension_semantics = [#tpu.dimension_semantics<parallel>], iteration_bounds = array<i64: 2>, scalar_prefetch = 0 : i64, scratch_operands = 0 : i64, tpu.core_type = #tpu.core_type<tc>, window_params = [{transform_indices = @transform_0, window_bounds = array<i64: 1, 16, 128>}, {transform_indices = @transform_1, window_bounds = array<i64: 1, 16, 128>}, {transform_indices = @transform_2, window_bounds = array<i64: 1, 16, 128>}, {pipeline_mode = #tpu.pipeline_mode<synchronous>, transform_indices = @transform_3, window_bounds = array<i64: 128, 128>}, {pipeline_mode = #tpu.pipeline_mode<synchronous>, transform_indices = @transform_4, window_bounds = array<i64: 1, 128>}, {pipeline_mode = #tpu.pipeline_mode<synchronous>, transform_indices = @transform_5, window_bounds = array<i64: 128, 128>}, {pipeline_mode = #tpu.pipeline_mode<synchronous>, transform_indices = @transform_6, window_bounds = array<i64: 1, 128>}, {pipeline_mode = #tpu.pipeline_mode<synchronous>, transform_indices = @transform_7, window_bounds = array<i64: 128, 128>}, {pipeline_mode = #tpu.pipeline_mode<synchronous>, transform_indices = @transform_8, window_bounds = array<i64: 1, 128>}, {pipeline_mode = #tpu.pipeline_mode<synchronous>, transform_indices = @transform_9, window_bounds = array<i64: 128, 128>}, {pipeline_mode = #tpu.pipeline_mode<synchronous>, transform_indices = @transform_10, window_bounds = array<i64: 1, 128>}, {transform_indices = @transform_11, window_bounds = array<i64: 1, 16, 128>}]} {
    %c0 = arith.constant 0 : index
    %c0_0 = arith.constant 0 : index
    %c0_1 = arith.constant 0 : index
    %0 = vector.load %arg1[%c0, %c0_0, %c0_1] : memref<1x16x128xf32, #tpu.memory_space<vmem>>, vector<1x16x128xf32>
    %1 = vector.shape_cast %0 : vector<1x16x128xf32> to vector<16x128xf32>
    %c0_2 = arith.constant 0 : index
    %c0_3 = arith.constant 0 : index
    %c0_4 = arith.constant 0 : index
    %2 = vector.load %arg2[%c0_2, %c0_3, %c0_4] : memref<1x16x128xf32, #tpu.memory_space<vmem>>, vector<1x16x128xf32>
    %3 = vector.shape_cast %2 : vector<1x16x128xf32> to vector<16x128xf32>
    %c0_5 = arith.constant 0 : index
    %c0_6 = arith.constant 0 : index
    %c0_7 = arith.constant 0 : index
    %4 = vector.load %arg3[%c0_5, %c0_6, %c0_7] : memref<1x16x128xf32, #tpu.memory_space<vmem>>, vector<1x16x128xf32>
    %5 = vector.shape_cast %4 : vector<1x16x128xf32> to vector<16x128xf32>
    %c0_8 = arith.constant 0 : index
    %c0_9 = arith.constant 0 : index
    %6 = vector.load %arg4[%c0_8, %c0_9] : memref<128x128xf32, #tpu.memory_space<vmem>>, vector<128x128xf32>
    %cst = arith.constant dense<0.000000e+00> : vector<16x128xf32>
    %7 = tpu.matmul %1, %6, %cst {dimension_numbers = #tpu.dot_dimension_numbers<[1], [0], [0], [1], [0, 0, 1, 1], [], []>} : vector<16x128xf32>, vector<128x128xf32>, vector<16x128xf32> -> vector<16x128xf32>
    %c0_10 = arith.constant 0 : index
    %c0_11 = arith.constant 0 : index
    %8 = vector.load %arg5[%c0_10, %c0_11] : memref<1x128xf32, #tpu.memory_space<vmem>>, vector<1x128xf32>
    %9 = vector.broadcast %8 : vector<1x128xf32> to vector<16x128xf32>
    %10 = arith.addf %7, %9 : vector<16x128xf32>
    %c0_12 = arith.constant 0 : index
    %c0_13 = arith.constant 0 : index
    %11 = vector.load %arg6[%c0_12, %c0_13] : memref<128x128xf32, #tpu.memory_space<vmem>>, vector<128x128xf32>
    %cst_14 = arith.constant dense<0.000000e+00> : vector<16x128xf32>
    %12 = tpu.matmul %3, %11, %cst_14 {dimension_numbers = #tpu.dot_dimension_numbers<[1], [0], [0], [1], [0, 0, 1, 1], [], []>} : vector<16x128xf32>, vector<128x128xf32>, vector<16x128xf32> -> vector<16x128xf32>
    %c0_15 = arith.constant 0 : index
    %c0_16 = arith.constant 0 : index
    %13 = vector.load %arg7[%c0_15, %c0_16] : memref<1x128xf32, #tpu.memory_space<vmem>>, vector<1x128xf32>
    %14 = vector.broadcast %13 : vector<1x128xf32> to vector<16x128xf32>
    %15 = arith.addf %12, %14 : vector<16x128xf32>
    %c0_17 = arith.constant 0 : index
    %c0_18 = arith.constant 0 : index
    %16 = vector.load %arg8[%c0_17, %c0_18] : memref<128x128xf32, #tpu.memory_space<vmem>>, vector<128x128xf32>
    %cst_19 = arith.constant dense<0.000000e+00> : vector<16x128xf32>
    %17 = tpu.matmul %5, %16, %cst_19 {dimension_numbers = #tpu.dot_dimension_numbers<[1], [0], [0], [1], [0, 0, 1, 1], [], []>} : vector<16x128xf32>, vector<128x128xf32>, vector<16x128xf32> -> vector<16x128xf32>
    %c0_20 = arith.constant 0 : index
    %c0_21 = arith.constant 0 : index
    %18 = vector.load %arg9[%c0_20, %c0_21] : memref<1x128xf32, #tpu.memory_space<vmem>>, vector<1x128xf32>
    %19 = vector.broadcast %18 : vector<1x128xf32> to vector<16x128xf32>
    %20 = arith.addf %17, %19 : vector<16x128xf32>
    %21 = vector.extract_strided_slice %10 {offsets = [0, 0], sizes = [16, 16], strides = [1, 1]} : vector<16x128xf32> to vector<16x16xf32>
    %22 = vector.extract_strided_slice %15 {offsets = [0, 0], sizes = [16, 16], strides = [1, 1]} : vector<16x128xf32> to vector<16x16xf32>
    %23 = vector.extract_strided_slice %20 {offsets = [0, 0], sizes = [16, 16], strides = [1, 1]} : vector<16x128xf32> to vector<16x16xf32>
    %cst_22 = arith.constant dense<0.000000e+00> : vector<16x16xf32>
    %24 = tpu.matmul %21, %22, %cst_22 {dimension_numbers = #tpu.dot_dimension_numbers<[1], [1], [0], [0], [0, 0, 1, 0], [], []>} : vector<16x16xf32>, vector<16x16xf32>, vector<16x16xf32> -> vector<16x16xf32>
    %cst_23 = arith.constant 2.500000e-01 : f32
    %25 = vector.broadcast %cst_23 : f32 to vector<16x16xf32>
    %26 = arith.mulf %24, %25 : vector<16x16xf32>
    %cst_24 = arith.constant dense<0xFF800000> : vector<16xf32>
    %27 = vector.multi_reduction <maximumf>, %26, %cst_24 [1] : vector<16x16xf32> to vector<16xf32>
    %28 = vector.shape_cast %27 : vector<16xf32> to vector<16x1xf32>
    %29 = vector.broadcast %28 : vector<16x1xf32> to vector<16x16xf32>
    %30 = arith.subf %26, %29 : vector<16x16xf32>
    %31 = math.exp %30 : vector<16x16xf32>
    %cst_25 = arith.constant dense<0.000000e+00> : vector<16xf32>
    %32 = vector.multi_reduction <add>, %31, %cst_25 [1] : vector<16x16xf32> to vector<16xf32>
    %33 = vector.shape_cast %32 : vector<16xf32> to vector<16x1xf32>
    %34 = tpu.reciprocal %33 {approx = true} : vector<16x1xf32> -> vector<16x1xf32>
    %35 = vector.broadcast %34 : vector<16x1xf32> to vector<16x16xf32>
    %36 = arith.mulf %31, %35 : vector<16x16xf32>
    %cst_26 = arith.constant dense<0.000000e+00> : vector<16x16xf32>
    %37 = tpu.matmul %36, %23, %cst_26 {dimension_numbers = #tpu.dot_dimension_numbers<[1], [0], [0], [1], [0, 0, 1, 1], [], []>} : vector<16x16xf32>, vector<16x16xf32>, vector<16x16xf32> -> vector<16x16xf32>
    %38 = vector.extract_strided_slice %10 {offsets = [0, 16], sizes = [16, 16], strides = [1, 1]} : vector<16x128xf32> to vector<16x16xf32>
    %39 = vector.extract_strided_slice %15 {offsets = [0, 16], sizes = [16, 16], strides = [1, 1]} : vector<16x128xf32> to vector<16x16xf32>
    %40 = vector.extract_strided_slice %20 {offsets = [0, 16], sizes = [16, 16], strides = [1, 1]} : vector<16x128xf32> to vector<16x16xf32>
    %cst_27 = arith.constant dense<0.000000e+00> : vector<16x16xf32>
    %41 = tpu.matmul %38, %39, %cst_27 {dimension_numbers = #tpu.dot_dimension_numbers<[1], [1], [0], [0], [0, 0, 1, 0], [], []>} : vector<16x16xf32>, vector<16x16xf32>, vector<16x16xf32> -> vector<16x16xf32>
    %cst_28 = arith.constant 2.500000e-01 : f32
    %42 = vector.broadcast %cst_28 : f32 to vector<16x16xf32>
    %43 = arith.mulf %41, %42 : vector<16x16xf32>
    %cst_29 = arith.constant dense<0xFF800000> : vector<16xf32>
    %44 = vector.multi_reduction <maximumf>, %43, %cst_29 [1] : vector<16x16xf32> to vector<16xf32>
    %45 = vector.shape_cast %44 : vector<16xf32> to vector<16x1xf32>
    %46 = vector.broadcast %45 : vector<16x1xf32> to vector<16x16xf32>
    %47 = arith.subf %43, %46 : vector<16x16xf32>
    %48 = math.exp %47 : vector<16x16xf32>
    %cst_30 = arith.constant dense<0.000000e+00> : vector<16xf32>
    %49 = vector.multi_reduction <add>, %48, %cst_30 [1] : vector<16x16xf32> to vector<16xf32>
    %50 = vector.shape_cast %49 : vector<16xf32> to vector<16x1xf32>
    %51 = tpu.reciprocal %50 {approx = true} : vector<16x1xf32> -> vector<16x1xf32>
    %52 = vector.broadcast %51 : vector<16x1xf32> to vector<16x16xf32>
    %53 = arith.mulf %48, %52 : vector<16x16xf32>
    %cst_31 = arith.constant dense<0.000000e+00> : vector<16x16xf32>
    %54 = tpu.matmul %53, %40, %cst_31 {dimension_numbers = #tpu.dot_dimension_numbers<[1], [0], [0], [1], [0, 0, 1, 1], [], []>} : vector<16x16xf32>, vector<16x16xf32>, vector<16x16xf32> -> vector<16x16xf32>
    %55 = vector.extract_strided_slice %10 {offsets = [0, 32], sizes = [16, 16], strides = [1, 1]} : vector<16x128xf32> to vector<16x16xf32>
    %56 = vector.extract_strided_slice %15 {offsets = [0, 32], sizes = [16, 16], strides = [1, 1]} : vector<16x128xf32> to vector<16x16xf32>
    %57 = vector.extract_strided_slice %20 {offsets = [0, 32], sizes = [16, 16], strides = [1, 1]} : vector<16x128xf32> to vector<16x16xf32>
    %cst_32 = arith.constant dense<0.000000e+00> : vector<16x16xf32>
    %58 = tpu.matmul %55, %56, %cst_32 {dimension_numbers = #tpu.dot_dimension_numbers<[1], [1], [0], [0], [0, 0, 1, 0], [], []>} : vector<16x16xf32>, vector<16x16xf32>, vector<16x16xf32> -> vector<16x16xf32>
    %cst_33 = arith.constant 2.500000e-01 : f32
    %59 = vector.broadcast %cst_33 : f32 to vector<16x16xf32>
    %60 = arith.mulf %58, %59 : vector<16x16xf32>
    %cst_34 = arith.constant dense<0xFF800000> : vector<16xf32>
    %61 = vector.multi_reduction <maximumf>, %60, %cst_34 [1] : vector<16x16xf32> to vector<16xf32>
    %62 = vector.shape_cast %61 : vector<16xf32> to vector<16x1xf32>
    %63 = vector.broadcast %62 : vector<16x1xf32> to vector<16x16xf32>
    %64 = arith.subf %60, %63 : vector<16x16xf32>
    %65 = math.exp %64 : vector<16x16xf32>
    %cst_35 = arith.constant dense<0.000000e+00> : vector<16xf32>
    %66 = vector.multi_reduction <add>, %65, %cst_35 [1] : vector<16x16xf32> to vector<16xf32>
    %67 = vector.shape_cast %66 : vector<16xf32> to vector<16x1xf32>
    %68 = tpu.reciprocal %67 {approx = true} : vector<16x1xf32> -> vector<16x1xf32>
    %69 = vector.broadcast %68 : vector<16x1xf32> to vector<16x16xf32>
    %70 = arith.mulf %65, %69 : vector<16x16xf32>
    %cst_36 = arith.constant dense<0.000000e+00> : vector<16x16xf32>
    %71 = tpu.matmul %70, %57, %cst_36 {dimension_numbers = #tpu.dot_dimension_numbers<[1], [0], [0], [1], [0, 0, 1, 1], [], []>} : vector<16x16xf32>, vector<16x16xf32>, vector<16x16xf32> -> vector<16x16xf32>
    %72 = vector.extract_strided_slice %10 {offsets = [0, 48], sizes = [16, 16], strides = [1, 1]} : vector<16x128xf32> to vector<16x16xf32>
    %73 = vector.extract_strided_slice %15 {offsets = [0, 48], sizes = [16, 16], strides = [1, 1]} : vector<16x128xf32> to vector<16x16xf32>
    %74 = vector.extract_strided_slice %20 {offsets = [0, 48], sizes = [16, 16], strides = [1, 1]} : vector<16x128xf32> to vector<16x16xf32>
    %cst_37 = arith.constant dense<0.000000e+00> : vector<16x16xf32>
    %75 = tpu.matmul %72, %73, %cst_37 {dimension_numbers = #tpu.dot_dimension_numbers<[1], [1], [0], [0], [0, 0, 1, 0], [], []>} : vector<16x16xf32>, vector<16x16xf32>, vector<16x16xf32> -> vector<16x16xf32>
    %cst_38 = arith.constant 2.500000e-01 : f32
    %76 = vector.broadcast %cst_38 : f32 to vector<16x16xf32>
    %77 = arith.mulf %75, %76 : vector<16x16xf32>
    %cst_39 = arith.constant dense<0xFF800000> : vector<16xf32>
    %78 = vector.multi_reduction <maximumf>, %77, %cst_39 [1] : vector<16x16xf32> to vector<16xf32>
    %79 = vector.shape_cast %78 : vector<16xf32> to vector<16x1xf32>
    %80 = vector.broadcast %79 : vector<16x1xf32> to vector<16x16xf32>
    %81 = arith.subf %77, %80 : vector<16x16xf32>
    %82 = math.exp %81 : vector<16x16xf32>
    %cst_40 = arith.constant dense<0.000000e+00> : vector<16xf32>
    %83 = vector.multi_reduction <add>, %82, %cst_40 [1] : vector<16x16xf32> to vector<16xf32>
    %84 = vector.shape_cast %83 : vector<16xf32> to vector<16x1xf32>
    %85 = tpu.reciprocal %84 {approx = true} : vector<16x1xf32> -> vector<16x1xf32>
    %86 = vector.broadcast %85 : vector<16x1xf32> to vector<16x16xf32>
    %87 = arith.mulf %82, %86 : vector<16x16xf32>
    %cst_41 = arith.constant dense<0.000000e+00> : vector<16x16xf32>
    %88 = tpu.matmul %87, %74, %cst_41 {dimension_numbers = #tpu.dot_dimension_numbers<[1], [0], [0], [1], [0, 0, 1, 1], [], []>} : vector<16x16xf32>, vector<16x16xf32>, vector<16x16xf32> -> vector<16x16xf32>
    %89 = vector.extract_strided_slice %10 {offsets = [0, 64], sizes = [16, 16], strides = [1, 1]} : vector<16x128xf32> to vector<16x16xf32>
    %90 = vector.extract_strided_slice %15 {offsets = [0, 64], sizes = [16, 16], strides = [1, 1]} : vector<16x128xf32> to vector<16x16xf32>
    %91 = vector.extract_strided_slice %20 {offsets = [0, 64], sizes = [16, 16], strides = [1, 1]} : vector<16x128xf32> to vector<16x16xf32>
    %cst_42 = arith.constant dense<0.000000e+00> : vector<16x16xf32>
    %92 = tpu.matmul %89, %90, %cst_42 {dimension_numbers = #tpu.dot_dimension_numbers<[1], [1], [0], [0], [0, 0, 1, 0], [], []>} : vector<16x16xf32>, vector<16x16xf32>, vector<16x16xf32> -> vector<16x16xf32>
    %cst_43 = arith.constant 2.500000e-01 : f32
    %93 = vector.broadcast %cst_43 : f32 to vector<16x16xf32>
    %94 = arith.mulf %92, %93 : vector<16x16xf32>
    %cst_44 = arith.constant dense<0xFF800000> : vector<16xf32>
    %95 = vector.multi_reduction <maximumf>, %94, %cst_44 [1] : vector<16x16xf32> to vector<16xf32>
    %96 = vector.shape_cast %95 : vector<16xf32> to vector<16x1xf32>
    %97 = vector.broadcast %96 : vector<16x1xf32> to vector<16x16xf32>
    %98 = arith.subf %94, %97 : vector<16x16xf32>
    %99 = math.exp %98 : vector<16x16xf32>
    %cst_45 = arith.constant dense<0.000000e+00> : vector<16xf32>
    %100 = vector.multi_reduction <add>, %99, %cst_45 [1] : vector<16x16xf32> to vector<16xf32>
    %101 = vector.shape_cast %100 : vector<16xf32> to vector<16x1xf32>
    %102 = tpu.reciprocal %101 {approx = true} : vector<16x1xf32> -> vector<16x1xf32>
    %103 = vector.broadcast %102 : vector<16x1xf32> to vector<16x16xf32>
    %104 = arith.mulf %99, %103 : vector<16x16xf32>
    %cst_46 = arith.constant dense<0.000000e+00> : vector<16x16xf32>
    %105 = tpu.matmul %104, %91, %cst_46 {dimension_numbers = #tpu.dot_dimension_numbers<[1], [0], [0], [1], [0, 0, 1, 1], [], []>} : vector<16x16xf32>, vector<16x16xf32>, vector<16x16xf32> -> vector<16x16xf32>
    %106 = vector.extract_strided_slice %10 {offsets = [0, 80], sizes = [16, 16], strides = [1, 1]} : vector<16x128xf32> to vector<16x16xf32>
    %107 = vector.extract_strided_slice %15 {offsets = [0, 80], sizes = [16, 16], strides = [1, 1]} : vector<16x128xf32> to vector<16x16xf32>
    %108 = vector.extract_strided_slice %20 {offsets = [0, 80], sizes = [16, 16], strides = [1, 1]} : vector<16x128xf32> to vector<16x16xf32>
    %cst_47 = arith.constant dense<0.000000e+00> : vector<16x16xf32>
    %109 = tpu.matmul %106, %107, %cst_47 {dimension_numbers = #tpu.dot_dimension_numbers<[1], [1], [0], [0], [0, 0, 1, 0], [], []>} : vector<16x16xf32>, vector<16x16xf32>, vector<16x16xf32> -> vector<16x16xf32>
    %cst_48 = arith.constant 2.500000e-01 : f32
    %110 = vector.broadcast %cst_48 : f32 to vector<16x16xf32>
    %111 = arith.mulf %109, %110 : vector<16x16xf32>
    %cst_49 = arith.constant dense<0xFF800000> : vector<16xf32>
    %112 = vector.multi_reduction <maximumf>, %111, %cst_49 [1] : vector<16x16xf32> to vector<16xf32>
    %113 = vector.shape_cast %112 : vector<16xf32> to vector<16x1xf32>
    %114 = vector.broadcast %113 : vector<16x1xf32> to vector<16x16xf32>
    %115 = arith.subf %111, %114 : vector<16x16xf32>
    %116 = math.exp %115 : vector<16x16xf32>
    %cst_50 = arith.constant dense<0.000000e+00> : vector<16xf32>
    %117 = vector.multi_reduction <add>, %116, %cst_50 [1] : vector<16x16xf32> to vector<16xf32>
    %118 = vector.shape_cast %117 : vector<16xf32> to vector<16x1xf32>
    %119 = tpu.reciprocal %118 {approx = true} : vector<16x1xf32> -> vector<16x1xf32>
    %120 = vector.broadcast %119 : vector<16x1xf32> to vector<16x16xf32>
    %121 = arith.mulf %116, %120 : vector<16x16xf32>
    %cst_51 = arith.constant dense<0.000000e+00> : vector<16x16xf32>
    %122 = tpu.matmul %121, %108, %cst_51 {dimension_numbers = #tpu.dot_dimension_numbers<[1], [0], [0], [1], [0, 0, 1, 1], [], []>} : vector<16x16xf32>, vector<16x16xf32>, vector<16x16xf32> -> vector<16x16xf32>
    %123 = vector.extract_strided_slice %10 {offsets = [0, 96], sizes = [16, 16], strides = [1, 1]} : vector<16x128xf32> to vector<16x16xf32>
    %124 = vector.extract_strided_slice %15 {offsets = [0, 96], sizes = [16, 16], strides = [1, 1]} : vector<16x128xf32> to vector<16x16xf32>
    %125 = vector.extract_strided_slice %20 {offsets = [0, 96], sizes = [16, 16], strides = [1, 1]} : vector<16x128xf32> to vector<16x16xf32>
    %cst_52 = arith.constant dense<0.000000e+00> : vector<16x16xf32>
    %126 = tpu.matmul %123, %124, %cst_52 {dimension_numbers = #tpu.dot_dimension_numbers<[1], [1], [0], [0], [0, 0, 1, 0], [], []>} : vector<16x16xf32>, vector<16x16xf32>, vector<16x16xf32> -> vector<16x16xf32>
    %cst_53 = arith.constant 2.500000e-01 : f32
    %127 = vector.broadcast %cst_53 : f32 to vector<16x16xf32>
    %128 = arith.mulf %126, %127 : vector<16x16xf32>
    %cst_54 = arith.constant dense<0xFF800000> : vector<16xf32>
    %129 = vector.multi_reduction <maximumf>, %128, %cst_54 [1] : vector<16x16xf32> to vector<16xf32>
    %130 = vector.shape_cast %129 : vector<16xf32> to vector<16x1xf32>
    %131 = vector.broadcast %130 : vector<16x1xf32> to vector<16x16xf32>
    %132 = arith.subf %128, %131 : vector<16x16xf32>
    %133 = math.exp %132 : vector<16x16xf32>
    %cst_55 = arith.constant dense<0.000000e+00> : vector<16xf32>
    %134 = vector.multi_reduction <add>, %133, %cst_55 [1] : vector<16x16xf32> to vector<16xf32>
    %135 = vector.shape_cast %134 : vector<16xf32> to vector<16x1xf32>
    %136 = tpu.reciprocal %135 {approx = true} : vector<16x1xf32> -> vector<16x1xf32>
    %137 = vector.broadcast %136 : vector<16x1xf32> to vector<16x16xf32>
    %138 = arith.mulf %133, %137 : vector<16x16xf32>
    %cst_56 = arith.constant dense<0.000000e+00> : vector<16x16xf32>
    %139 = tpu.matmul %138, %125, %cst_56 {dimension_numbers = #tpu.dot_dimension_numbers<[1], [0], [0], [1], [0, 0, 1, 1], [], []>} : vector<16x16xf32>, vector<16x16xf32>, vector<16x16xf32> -> vector<16x16xf32>
    %140 = vector.extract_strided_slice %10 {offsets = [0, 112], sizes = [16, 16], strides = [1, 1]} : vector<16x128xf32> to vector<16x16xf32>
    %141 = vector.extract_strided_slice %15 {offsets = [0, 112], sizes = [16, 16], strides = [1, 1]} : vector<16x128xf32> to vector<16x16xf32>
    %142 = vector.extract_strided_slice %20 {offsets = [0, 112], sizes = [16, 16], strides = [1, 1]} : vector<16x128xf32> to vector<16x16xf32>
    %cst_57 = arith.constant dense<0.000000e+00> : vector<16x16xf32>
    %143 = tpu.matmul %140, %141, %cst_57 {dimension_numbers = #tpu.dot_dimension_numbers<[1], [1], [0], [0], [0, 0, 1, 0], [], []>} : vector<16x16xf32>, vector<16x16xf32>, vector<16x16xf32> -> vector<16x16xf32>
    %cst_58 = arith.constant 2.500000e-01 : f32
    %144 = vector.broadcast %cst_58 : f32 to vector<16x16xf32>
    %145 = arith.mulf %143, %144 : vector<16x16xf32>
    %cst_59 = arith.constant dense<0xFF800000> : vector<16xf32>
    %146 = vector.multi_reduction <maximumf>, %145, %cst_59 [1] : vector<16x16xf32> to vector<16xf32>
    %147 = vector.shape_cast %146 : vector<16xf32> to vector<16x1xf32>
    %148 = vector.broadcast %147 : vector<16x1xf32> to vector<16x16xf32>
    %149 = arith.subf %145, %148 : vector<16x16xf32>
    %150 = math.exp %149 : vector<16x16xf32>
    %cst_60 = arith.constant dense<0.000000e+00> : vector<16xf32>
    %151 = vector.multi_reduction <add>, %150, %cst_60 [1] : vector<16x16xf32> to vector<16xf32>
    %152 = vector.shape_cast %151 : vector<16xf32> to vector<16x1xf32>
    %153 = tpu.reciprocal %152 {approx = true} : vector<16x1xf32> -> vector<16x1xf32>
    %154 = vector.broadcast %153 : vector<16x1xf32> to vector<16x16xf32>
    %155 = arith.mulf %150, %154 : vector<16x16xf32>
    %cst_61 = arith.constant dense<0.000000e+00> : vector<16x16xf32>
    %156 = tpu.matmul %155, %142, %cst_61 {dimension_numbers = #tpu.dot_dimension_numbers<[1], [0], [0], [1], [0, 0, 1, 1], [], []>} : vector<16x16xf32>, vector<16x16xf32>, vector<16x16xf32> -> vector<16x16xf32>
    %157 = tpu.concatenate %37, %54, %71, %88, %105, %122, %139, %156 in 1 : vector<16x16xf32>, vector<16x16xf32>, vector<16x16xf32>, vector<16x16xf32>, vector<16x16xf32>, vector<16x16xf32>, vector<16x16xf32>, vector<16x16xf32> -> vector<16x128xf32>
    %c0_62 = arith.constant 0 : index
    %c0_63 = arith.constant 0 : index
    %158 = vector.load %arg10[%c0_62, %c0_63] : memref<128x128xf32, #tpu.memory_space<vmem>>, vector<128x128xf32>
    %cst_64 = arith.constant dense<0.000000e+00> : vector<16x128xf32>
    %159 = tpu.matmul %157, %158, %cst_64 {dimension_numbers = #tpu.dot_dimension_numbers<[1], [0], [0], [1], [0, 0, 1, 1], [], []>} : vector<16x128xf32>, vector<128x128xf32>, vector<16x128xf32> -> vector<16x128xf32>
    %c0_65 = arith.constant 0 : index
    %c0_66 = arith.constant 0 : index
    %160 = vector.load %arg11[%c0_65, %c0_66] : memref<1x128xf32, #tpu.memory_space<vmem>>, vector<1x128xf32>
    %161 = vector.broadcast %160 : vector<1x128xf32> to vector<16x128xf32>
    %162 = arith.addf %159, %161 : vector<16x128xf32>
    %c0_67 = arith.constant 0 : index
    %c0_68 = arith.constant 0 : index
    %c0_69 = arith.constant 0 : index
    %163 = vector.load %arg12[%c0_67, %c0_68, %c0_69] : memref<1x16x128xf32, #tpu.memory_space<vmem>>, vector<1x16x128xf32>
    %164 = vector.shape_cast %163 : vector<1x16x128xf32> to vector<16x128xf32>
    %165 = vector.shape_cast %162 : vector<16x128xf32> to vector<1x16x128xf32>
    tpu.vector_store %arg12[%c0_67, %c0_68, %c0_69], %165 {strides = array<i32>} : memref<1x16x128xf32, #tpu.memory_space<vmem>>, vector<1x16x128xf32>,
    return
  }
  func.func @transform_0(%arg0: i32) -> (i32, i32, i32) {
    %c0_i32 = arith.constant 0 : i32
    %c0_i32_0 = arith.constant 0 : i32
    %c0_i32_1 = arith.constant 0 : i32
    return %arg0, %c0_i32, %c0_i32_0 : i32, i32, i32
  }
  func.func @transform_1(%arg0: i32) -> (i32, i32, i32) {
    %c0_i32 = arith.constant 0 : i32
    %c0_i32_0 = arith.constant 0 : i32
    %c0_i32_1 = arith.constant 0 : i32
    return %arg0, %c0_i32, %c0_i32_0 : i32, i32, i32
  }
  func.func @transform_2(%arg0: i32) -> (i32, i32, i32) {
    %c0_i32 = arith.constant 0 : i32
    %c0_i32_0 = arith.constant 0 : i32
    %c0_i32_1 = arith.constant 0 : i32
    return %arg0, %c0_i32, %c0_i32_0 : i32, i32, i32
  }
  func.func @transform_3(%arg0: i32) -> (i32, i32) {
    %c0_i32 = arith.constant 0 : i32
    %c0_i32_0 = arith.constant 0 : i32
    %c0_i32_1 = arith.constant 0 : i32
    return %c0_i32, %c0_i32_0 : i32, i32
  }
  func.func @transform_4(%arg0: i32) -> (i32, i32) {
    %c0_i32 = arith.constant 0 : i32
    %c0_i32_0 = arith.constant 0 : i32
    %c0_i32_1 = arith.constant 0 : i32
    return %c0_i32, %c0_i32_0 : i32, i32
  }
  func.func @transform_5(%arg0: i32) -> (i32, i32) {
    %c0_i32 = arith.constant 0 : i32
    %c0_i32_0 = arith.constant 0 : i32
    %c0_i32_1 = arith.constant 0 : i32
    return %c0_i32, %c0_i32_0 : i32, i32
  }
  func.func @transform_6(%arg0: i32) -> (i32, i32) {
    %c0_i32 = arith.constant 0 : i32
    %c0_i32_0 = arith.constant 0 : i32
    %c0_i32_1 = arith.constant 0 : i32
    return %c0_i32, %c0_i32_0 : i32, i32
  }
  func.func @transform_7(%arg0: i32) -> (i32, i32) {
    %c0_i32 = arith.constant 0 : i32
    %c0_i32_0 = arith.constant 0 : i32
    %c0_i32_1 = arith.constant 0 : i32
    return %c0_i32, %c0_i32_0 : i32, i32
  }
  func.func @transform_8(%arg0: i32) -> (i32, i32) {
    %c0_i32 = arith.constant 0 : i32
    %c0_i32_0 = arith.constant 0 : i32
    %c0_i32_1 = arith.constant 0 : i32
    return %c0_i32, %c0_i32_0 : i32, i32
  }
  func.func @transform_9(%arg0: i32) -> (i32, i32) {
    %c0_i32 = arith.constant 0 : i32
    %c0_i32_0 = arith.constant 0 : i32
    %c0_i32_1 = arith.constant 0 : i32
    return %c0_i32, %c0_i32_0 : i32, i32
  }
  func.func @transform_10(%arg0: i32) -> (i32, i32) {
    %c0_i32 = arith.constant 0 : i32
    %c0_i32_0 = arith.constant 0 : i32
    %c0_i32_1 = arith.constant 0 : i32
    return %c0_i32, %c0_i32_0 : i32, i32
  }
  func.func @transform_11(%arg0: i32) -> (i32, i32, i32) {
    %c0_i32 = arith.constant 0 : i32
    %c0_i32_0 = arith.constant 0 : i32
    %c0_i32_1 = arith.constant 0 : i32
    return %arg0, %c0_i32, %c0_i32_0 : i32, i32, i32
  }
}

</mosaic_0001>

<bundles_post_ra>
// kernel: tpu_custom_call.1
= control target key start
LH: loop header
LB: loop body
LE: loop exit
PB: predicated region body
PF: predicated region fallthrough
CT: control target
= control target key end

     0   :  { %s4781_s0 = inlined_call_operand.hbm [shape: f32[2,16,128], index: 0, kind: input, shape index: {}]   ;;  %s4782_s1 = inlined_call_operand.hbm [shape: f32[2,16,128], index: 1, kind: input, shape index: {}]   ;;  %s4783_s2 = inlined_call_operand.hbm [shape: f32[2,16,128], index: 2, kind: input, shape index: {}]   ;;  %s4784_s3 = inlined_call_operand.hbm [shape: f32[128,128], index: 3, kind: input, shape index: {}]   ;;  %s4785_s4 = inlined_call_operand.vmem [shape: f32[1,128], index: 4, kind: input, shape index: {}]   ;;  %s4786_s5 = inlined_call_operand.hbm [shape: f32[128,128], index: 5, kind: input, shape index: {}]   ;;  %s4787_s6 = inlined_call_operand.vmem [shape: f32[1,128], index: 6, kind: input, shape index: {}]   ;;  %s4788_s7 = inlined_call_operand.hbm [shape: f32[128,128], index: 7, kind: input, shape index: {}]   ;;  %s4789_s8 = inlined_call_operand.vmem [shape: f32[1,128], index: 8, kind: input, shape index: {}]   ;;  %s4790_s9 = inlined_call_operand.hbm [shape: f32[128,128], index: 9, kind: input, shape index: {}]   ;;  %s4791_s10 = inlined_call_operand.vmem [shape: f32[1,128], index: 10, kind: input, shape index: {}]   ;;  %s4792_s11 = inlined_call_operand.hbm [shape: f32[2,16,128], index: 11, kind: output, shape index: {}]  }
   0x1   :  { %4818 = sst [smem:[#allocation26_spill]] %s4782_s1 }
   0x2   :  { %4819 = sst [smem:[#allocation27_spill]] %s4784_s3 }
   0x3   :  { %4820 = sst [smem:[#allocation28_spill]] %s4785_s4 }
   0x4   :  { %4821 = sst [smem:[#allocation29_spill]] %s4788_s7 }
   0x5   :  { %4822 = sst [smem:[#allocation30_spill]] %s4789_s8 }
   0x6   :  { %4823 = sst [smem:[#allocation31_spill]] %s4791_s10 }
   0x7   :  { %4824 = sst [smem:[#allocation32_spill]] %s4792_s11 }
   0x8   :  { %16 = vsyncpa [#allocation3], 0 }
   0x9   :  { %18 = vsyncpa [#allocation3 + $0x1], 0 }
   0xa   :  { %19 = vsyncpa [#allocation6], 0 }
   0xb   :  { %21 = vsyncpa [#allocation6 + $0x1], 0 }
   0xc   :  { %22 = vsyncpa [#allocation9], 0 }
   0xd   :  { %23 = vsyncpa [#allocation12], 0 }
   0xe   :  { %24 = vsyncpa [#allocation4], 0 }
   0xf   :  { %26 = vsyncpa [#allocation4 + $0x1], 0  ;;  %s4113_s17 = smov 0   ;;  %s4115_s18 = smov 0  }
  0x10   :  { %s4117_s19 = smov 0   ;;  %s4119_s20 = smov 0  }
  0x11 LB: > { %4825 = sst [smem:[#allocation20_spill]] %s4020_s17  ;;  %s4134_s21 = sadd.s32 4294967295, %s4032_s20   ;;  %s4032_s20 = sphi %s4119_s20, %s4869_s20   ;;  %s4028_s19 = sphi %s4117_s19, %s4873_s19   ;;  %s4024_s18 = sphi %s4115_s18, %s4872_s18   ;;  %s4020_s17 = sphi %s4113_s17, %s4871_s17  }
  0x12   : > { %4826 = sst [smem:[#allocation21_spill]] %s4032_s20  ;;  %s2793_s22 = sadd.s32 4294967294, %s4032_s20  }
  0x13   : > { %p52_p0 = scmp.ne.s32.totalorder %s4024_s18, %s4020_s17  ;;  %p4793_p1 = scmp.eq.s32.totalorder %s4134_s21, 0 }
  0x14   : > { %p302_p3 = scmp.eq.s32.totalorder %s2793_s22, 1  ;;  %p2794_p5 = scmp.ge.s32.totalorder %s4032_s20, 1 }
  0x15   : > { %p4143_p4 = por %p4793_p1, %p52_p0  ;;  %p309_p7 = scmp.lt.s32.totalorder %s4032_s20, 3 }
  0x16   : > { %p4148_p6 = por %p302_p3, %p52_p0  ;;  %s4034_s26 = smov [#allocation8]  }
  0x17   : > { %s4827_s23 = scalar_select %p4143_p4, 1, 0 }
  0x18   : > { %s4828_s24 = scalar_select %p4148_p6, 1, 0 }
  0x19   : > { %p4153_p8 = pnand %p2794_p5, %p309_p7  ;;  %s321_s27 = sshll.u32 %s4034_s26, 4  ;;  %s4157_s27 = int_to_ptr.vmem [resolvable:$true] %s321_s27 }
  0x1a   : > { %4829 = sst [smem:[#allocation22_spill]] %s4828_s24  ;;  %s4035_s29 = smov [#allocation11]  }
  0x1b   : > { %s4830_s25 = scalar_select %p4153_p8, 1, 0 }
  0x1c   : > { %p3499_p9 = pneg %p4153_p8  ;;  %s353_s30 = sshll.u32 %s4035_s29, 4  ;;  %s4168_s30 = int_to_ptr.vmem [resolvable:$true] %s353_s30 }
  0x1d   : > { %s4832_s3 = sld [smem:[#allocation27_spill]] }
  0x1e   : > { %p4164_p11 = pnand %p3499_p9, %p4793_p1 }
  0x20   : > { %s4831_s28 = scalar_select %p4164_p11, 1, 0 }
  0x21   : > { %p4178_p13 = pneg %p4164_p11 }
  0x23   : > { %s3752_s14 = scalar_lea.hbm %s4832_s3, 2048 }
  0x24   : > { %p3753_p12 = scmp.ne.s32.totalorder %s4832_s3, %s3752_s14  ;;  %p3759_p5 = scmp.lt.u32.totalorder %s3752_s14, %s4832_s3 }
  0x25   : > { %s4833_s22 = scalar_select %p4178_p13, 1, 0 }
  0x26   : > { %p3755_p0 = pnand %p4178_p13, %p3753_p12 }
  0x28   : > { %p3756_p3 = pneg %p3755_p0 }
  0x2a   : > { %p3761_p7 = pnand %p3759_p5, %p3756_p3 }
  0x2c   : > { %3764 = shalt.err (!%p3761_p7)
}
  0x2d   : > { %s3765_s12 = scalar_lea.vmem %s4157_s27, 2048  ;;  %p3773_p2 = scmp.lt.s32.totalorder %s4157_s27, %s4157_s27 }
  0x2e   : > { %p3766_p9 = scmp.ne.s32.totalorder %s4157_s27, %s3765_s12  ;;  %p3774_p6 = scmp.lt.s32.totalorder %s3765_s12, %s3765_s12 }
  0x30   : > { %p3768_p10 = pnand %p3766_p9, %p4178_p13  ;;  %p3775_p12 = por %p3774_p6, %p3773_p2 }
  0x32   : > { %p3769_p1 = pneg %p3768_p10 }
  0x34   : > { %p3776_p0 = pnand %p3775_p12, %p3769_p1 }
  0x36   : > { %3779 = shalt.err (!%p3776_p0)
}
  0x37   : > { %s4798_s13 = smov 128   ;;  %s4800_s14 = smov 8  }
  0x38   : > { %3502 = dma.hbm_to_vmem [thread:$0]  (!%p4164_p11), %s4832_s3, 2048, %s4157_s27, [#allocation9], %s4798_s13, %s4798_s13, %s4800_s14  }
  0x39   : > { %s4834_s7 = sld [smem:[#allocation29_spill]] }
  0x3f   : > { %s3780_s12 = scalar_lea.hbm %s4834_s7, 2048 }
  0x40   : > { %p3781_p1 = scmp.ne.s32.totalorder %s4834_s7, %s3780_s12  ;;  %p3787_p10 = scmp.lt.u32.totalorder %s3780_s12, %s4834_s7 }
  0x42   : > { %p3783_p2 = pnand %p3781_p1, %p4178_p13 }
  0x44   : > { %p3784_p6 = pneg %p3783_p2 }
  0x46   : > { %p3789_p3 = pnand %p3787_p10, %p3784_p6 }
  0x48   : > { %3792 = shalt.err (!%p3789_p3)
}
  0x49   : > { %s3793_s27 = scalar_lea.vmem %s4168_s30, 2048  ;;  %p3801_p12 = scmp.lt.s32.totalorder %s4168_s30, %s4168_s30 }
  0x4a   : > { %p3794_p5 = scmp.ne.s32.totalorder %s4168_s30, %s3793_s27  ;;  %p3802_p0 = scmp.lt.s32.totalorder %s3793_s27, %s3793_s27 }
  0x4c   : > { %p3796_p7 = pnand %p3794_p5, %p4178_p13  ;;  %p3803_p1 = por %p3802_p0, %p3801_p12 }
  0x4e   : > { %p3797_p9 = pneg %p3796_p7 }
  0x50   : > { %p3804_p2 = pnand %p3803_p1, %p3797_p9 }
  0x52   : > { %3807 = shalt.err (!%p3804_p2)
}
  0x53   : > { %3508 = dma.hbm_to_vmem [thread:$0]  (!%p4164_p11), %s4834_s7, 2048, %s4168_s30, [#allocation12], %s4798_s13, %s4798_s13, %s4800_s14  }
  0x54   : > { %s4229_s17 = sadd.s32 1, %s4032_s20   ;;  %s39_s24 = sadd.s32 1, %s4028_s19 }
  0x55   : > { %4835 = sst [smem:[#allocation23_spill]] %s4229_s17  ;;  %s36_s15 = ssub.s32 %s4032_s20, %s4229_s17 }
  0x56   : > { %p46_p6 = scmp.ne.s32.totalorder %s4028_s19, %s4024_s18  ;;  %p37_p10 = scmp.eq.s32.totalorder %s36_s15, 0 }
  0x57   : > { %p47_p3 = scmp.eq.s32.totalorder %s4032_s20, 0  ;;  %p4836_p5 = scmp.eq.s32.totalorder %s4134_s21, 1 }
  0x58   : > { %p3530_p9 = scmp.lt.s32.totalorder %s4032_s20, 2  ;;  %s4797_s29 = sand.u32 1, %s4028_s19  }
  0x59   : > { %p4239_p7 = por %p4836_p5, %p46_p6  ;;  %p48_p12 = por %p47_p3, %p46_p6 }
  0x5a   : > { %s4245_s26 = scalar_select %p37_p10, %s4028_s19, %s39_s24  }
  0x5b   : > { %s4837_s16 = scalar_select %p4239_p7, 1, 0 }
  0x5c   : > { %4839 = sst [smem:[#allocation25_spill]] %s4245_s26  ;;  %s4250_s30 = sshll.u32 %s4797_s29, 4 }
  0x5d   : > { %4838 = sst [smem:[#allocation24_spill]] %s4837_s16  ;;  %s4253_s12 = sshll.u32 %s4032_s20, 8 }
  0x5e   : > { %p4255_p0 = pnand %p3530_p9, %p48_p12  ;;  %s407_s10 = sand.u32 1, %s4032_s20  }
  0x5f   : > { %s4841_s1 = sld [smem:[#allocation26_spill]]  ;;  %s411_s29 = scalar_lea.vmem [#allocation5], %s4250_s30 }
  0x60   : > { %s4840_s27 = scalar_select %p4255_p0, 1, 0 }
  0x61   : > { %s418_s13 = sshll.u32 %s411_s29, 4  ;;  %s4038_s14 = smov [#allocation10]   ;;  %s4267_s13 = int_to_ptr.vmem [resolvable:$true] %s418_s13 }
  0x62   : > { %s4269_s3 = sshll.u32 %s4038_s14, 4  ;;  %s4271_s7 = scalar_lea.sflag [#allocation6], %s407_s10  ;;  %s338_s3 = int_to_ptr.vmem [resolvable:$true] %s4269_s3 }
  0x63   : > { %p4277_p2 = pneg %p4255_p0 }
  0x65   : > { %s4264_s24 = scalar_lea.hbm %s4841_s1, %s4253_s12  ;;  %s3813_s17 = scalar_lea.hbm %s4841_s1, 512 }
  0x66   : > { %s3808_s26 = scalar_lea.hbm %s4264_s24, 256  ;;  %p3814_p3 = scmp.lt.u32.totalorder %s4264_s24, %s4841_s1 }
  0x67   : > { %p3809_p1 = scmp.ne.s32.totalorder %s4264_s24, %s3808_s26  ;;  %p3815_p5 = scmp.lt.u32.totalorder %s3813_s17, %s3808_s26 }
  0x68   : > { %s4842_s11 = scalar_select %p4277_p2, 1, 0 }
  0x69   : > { %p3811_p6 = pnand %p4277_p2, %p3809_p1  ;;  %p3816_p9 = por %p3815_p5, %p3814_p3 }
  0x6a   : > { %p3817_p12 = scmp.lt.u32.totalorder %s3808_s26, %s4264_s24 }
  0x6b   : > { %p3812_p10 = pneg %p3811_p6 }
  0x6c   : > { %p3818_p7 = por %p3817_p12, %p3816_p9 }
  0x6e   : > { %p3819_p4 = pnand %p3818_p7, %p3812_p10 }
  0x70   : > { %3822 = shalt.err (!%p3819_p4)
}
  0x71   : > { %s3823_s10 = scalar_lea.vmem %s4267_s13, 256  ;;  %s4039_s15 = smov [#allocation5]  }
  0x72   : > { %p3824_p1 = scmp.ne.s32.totalorder %s4267_s13, %s3823_s10  ;;  %s3828_s29 = sshll.u32 %s4039_s15, 4  ;;  %s3829_s29 = int_to_ptr.vmem [resolvable:$false] %s3828_s29 }
  0x73   : > { %s3830_s20 = scalar_lea.vmem %s3829_s29, 512  ;;  %p3831_p11 = scmp.lt.s32.totalorder %s4267_s13, %s3829_s29 }
  0x74   : > { %p3826_p6 = pnand %p3824_p1, %p4277_p2  ;;  %p3832_p13 = scmp.lt.s32.totalorder %s3830_s20, %s3823_s10 }
  0x76   : > { %p3827_p8 = pneg %p3826_p6  ;;  %p3833_p3 = por %p3832_p13, %p3831_p11 }
  0x78   : > { %p3834_p5 = pnand %p3833_p3, %p3827_p8 }
  0x7a   : > { %3837 = shalt.err (!%p3834_p5)
}
  0x7b   : > { %s4843_s17 = smov 8   ;;  %s4844_s26 = smov 128  }
  0x7c   : > { %3518 = dma.hbm_to_vmem [thread:$0]  (!%p4255_p0), %s4264_s24, 256, %s4267_s13, %s4271_s7, %s4844_s26, %s4844_s26, %s4843_s17  }
  0x7d   : > { %s3838_s29 = scalar_lea.hbm %s4786_s5, 2048  ;;  %p4845_p8 = scmp.ne.s32.totalorder %s4833_s22, 0 }
  0x7e   : > { %p3839_p4 = scmp.ne.s32.totalorder %s4786_s5, %s3838_s29  ;;  %p3845_p7 = scmp.lt.u32.totalorder %s3838_s29, %s4786_s5 }
  0x80   : > { %p3841_p11 = pnand %p3839_p4, %p4845_p8 }
  0x82   : > { %p3842_p13 = pneg %p3841_p11 }
  0x84   : > { %p3847_p10 = pnand %p3845_p7, %p3842_p13 }
  0x86   : > { %3850 = shalt.err (!%p3847_p10)
}
  0x87   : > { %s3851_s8 = scalar_lea.vmem %s338_s3, 2048  ;;  %p3859_p6 = scmp.lt.s32.totalorder %s338_s3, %s338_s3 }
  0x88   : > { %p3852_p9 = scmp.ne.s32.totalorder %s338_s3, %s3851_s8  ;;  %p3860_p3 = scmp.lt.s32.totalorder %s3851_s8, %s3851_s8 }
  0x8a   : > { %p3854_p12 = pnand %p3852_p9, %p4845_p8  ;;  %p3861_p5 = por %p3860_p3, %p3859_p6 }
  0x8c   : > { %p3855_p1 = pneg %p3854_p12 }
  0x8e   : > { %p3862_p0 = pnand %p3861_p5, %p3855_p1 }
  0x90   : > { %3865 = shalt.err (!%p3862_p0)
}
  0x91   : > { %p4846_p4 = scmp.ne.s32.totalorder %s4831_s28, 0  ;;  %s4040_s16 = smov [#allocation13]  }
  0x92   : > { %s369_s24 = sshll.u32 %s4040_s16, 4  ;;  %s3866_s8 = scalar_lea.hbm %s4790_s9, 2048  ;;  %s370_s24 = int_to_ptr.vmem [resolvable:$true] %s369_s24 }
  0x93   : > { %3505 = dma.hbm_to_vmem [thread:$0]  (!%p4846_p4), %s4786_s5, 2048, %s338_s3, [#allocation9], %s4844_s26, %s4844_s26, %s4843_s17  }
  0x94   : > { %p3867_p0 = scmp.ne.s32.totalorder %s4790_s9, %s3866_s8  ;;  %p3873_p7 = scmp.lt.u32.totalorder %s3866_s8, %s4790_s9 }
  0x96   : > { %p3869_p11 = pnand %p3867_p0, %p4845_p8 }
  0x98   : > { %p3870_p13 = pneg %p3869_p11 }
  0x9a   : > { %p3875_p10 = pnand %p3873_p7, %p3870_p13 }
  0x9c   : > { %3878 = shalt.err (!%p3875_p10)
}
  0x9d   : > { %s3879_s3 = scalar_lea.vmem %s370_s24, 2048  ;;  %p3887_p6 = scmp.lt.s32.totalorder %s370_s24, %s370_s24 }
  0x9e   : > { %p3880_p9 = scmp.ne.s32.totalorder %s370_s24, %s3879_s3  ;;  %p3888_p3 = scmp.lt.s32.totalorder %s3879_s3, %s3879_s3 }
  0xa0   : > { %p3882_p12 = pnand %p3880_p9, %p4845_p8  ;;  %p3889_p5 = por %p3888_p3, %p3887_p6 }
  0xa2   : > { %p3883_p1 = pneg %p3882_p12 }
  0xa4   : > { %p3890_p2 = pnand %p3889_p5, %p3883_p1 }
  0xa6   : > { %3893 = shalt.err (!%p3890_p2)
}
  0xa7   : > { %3511 = dma.hbm_to_vmem [thread:$0]  (!%p4846_p4), %s4790_s9, 2048, %s370_s24, [#allocation12], %s4844_s26, %s4844_s26, %s4843_s17  }
  0xa8   : > { %s4351_s16 = scalar_lea.hbm %s4781_s0, %s4253_s12  ;;  %s390_s28 = scalar_lea.vmem [#allocation2], %s4250_s30 }
  0xa9   : > { %s397_s14 = sshll.u32 %s390_s28, 4  ;;  %s4847_s15 = sand.u32 1, %s4028_s19   ;;  %s4354_s14 = int_to_ptr.vmem [resolvable:$true] %s397_s14 }
  0xaa   : > { %s4358_s8 = scalar_lea.sflag [#allocation3], %s4847_s15  ;;  %s3894_s29 = scalar_lea.hbm %s4351_s16, 256 }
  0xab   : > { %p3895_p2 = scmp.ne.s32.totalorder %s4351_s16, %s3894_s29  ;;  %p4848_p8 = scmp.ne.s32.totalorder %s4842_s11, 0 }
  0xac   : > { %s3899_s20 = scalar_lea.hbm %s4781_s0, 512  ;;  %p3900_p11 = scmp.lt.u32.totalorder %s4351_s16, %s4781_s0 }
  0xad   : > { %p3897_p4 = pnand %p3895_p2, %p4848_p8  ;;  %p3901_p13 = scmp.lt.u32.totalorder %s3899_s20, %s3894_s29 }
  0xae   : > { %p3903_p10 = scmp.lt.u32.totalorder %s3894_s29, %s4351_s16 }
  0xaf   : > { %p3898_p0 = pneg %p3897_p4  ;;  %p3902_p7 = por %p3901_p13, %p3900_p11 }
  0xb1   : > { %p3904_p9 = por %p3903_p10, %p3902_p7 }
  0xb3   : > { %p3905_p12 = pnand %p3904_p9, %p3898_p0 }
  0xb5   : > { %3908 = shalt.err (!%p3905_p12)
}
  0xb6   : > { %s3909_s1 = scalar_lea.vmem %s4354_s14, 256  ;;  %s4041_s22 = smov [#allocation2]  }
  0xb7   : > { %p3910_p1 = scmp.ne.s32.totalorder %s4354_s14, %s3909_s1  ;;  %s3914_s13 = sshll.u32 %s4041_s22, 4  ;;  %s3915_s13 = int_to_ptr.vmem [resolvable:$false] %s3914_s13 }
  0xb8   : > { %s3916_s28 = scalar_lea.vmem %s3915_s13, 512  ;;  %p3917_p5 = scmp.lt.s32.totalorder %s4354_s14, %s3915_s13 }
  0xb9   : > { %p3912_p6 = pnand %p3910_p1, %p4848_p8  ;;  %p3918_p2 = scmp.lt.s32.totalorder %s3916_s28, %s3909_s1 }
  0xbb   : > { %p3913_p3 = pneg %p3912_p6  ;;  %p3919_p4 = por %p3918_p2, %p3917_p5 }
  0xbd   : > { %p3920_p11 = pnand %p3919_p4, %p3913_p3 }
  0xbf   : > { %3923 = shalt.err (!%p3920_p11)
}
  0xc0   : > { %p4849_p0 = scmp.ne.s32.totalorder %s4840_s27, 0  ;;  %s4389_s24 = scalar_lea.hbm %s4783_s2, %s4253_s12 }
  0xc1   : > { %s432_s10 = scalar_lea.vmem [#allocation7], %s4250_s30  ;;  %s3924_s3 = scalar_lea.hbm %s4389_s24, 256 }
  0xc2   : > { %3515 = dma.hbm_to_vmem [thread:$0]  (!%p4849_p0), %s4351_s16, 256, %s4354_s14, %s4358_s8, %s4844_s26, %s4844_s26, %s4843_s17  }
  0xc3   : > { %s439_s20 = sshll.u32 %s432_s10, 4  ;;  %p3925_p13 = scmp.ne.s32.totalorder %s4389_s24, %s3924_s3  ;;  %s4392_s20 = int_to_ptr.vmem [resolvable:$true] %s439_s20 }
  0xc4   : > { %s3929_s14 = scalar_lea.hbm %s4783_s2, 512  ;;  %p3930_p9 = scmp.lt.u32.totalorder %s4389_s24, %s4783_s2 }
  0xc5   : > { %p3927_p7 = pnand %p3925_p13, %p4848_p8  ;;  %p3931_p12 = scmp.lt.u32.totalorder %s3929_s14, %s3924_s3 }
  0xc6   : > { %p3933_p6 = scmp.lt.u32.totalorder %s3924_s3, %s4389_s24 }
  0xc7   : > { %p3928_p10 = pneg %p3927_p7  ;;  %p3932_p1 = por %p3931_p12, %p3930_p9 }
  0xc9   : > { %p3934_p3 = por %p3933_p6, %p3932_p1 }
  0xcb   : > { %p3935_p5 = pnand %p3934_p3, %p3928_p10 }
  0xcd   : > { %3938 = shalt.err (!%p3935_p5)
}
  0xce   : > { %s3939_s30 = scalar_lea.vmem %s4392_s20, 256  ;;  %s4042_s1 = smov [#allocation7]  }
  0xcf   : > { %p3940_p2 = scmp.ne.s32.totalorder %s4392_s20, %s3939_s30  ;;  %s3944_s22 = sshll.u32 %s4042_s1, 4  ;;  %s3945_s22 = int_to_ptr.vmem [resolvable:$false] %s3944_s22 }
  0xd0   : > { %s3946_s13 = scalar_lea.vmem %s3945_s22, 512  ;;  %p3947_p13 = scmp.lt.s32.totalorder %s4392_s20, %s3945_s22 }
  0xd1   : > { %p3942_p4 = pnand %p3940_p2, %p4848_p8  ;;  %p3948_p7 = scmp.lt.s32.totalorder %s3946_s13, %s3939_s30 }
  0xd3   : > { %p3943_p11 = pneg %p3942_p4  ;;  %p3949_p9 = por %p3948_p7, %p3947_p13 }
  0xd5   : > { %p3950_p12 = pnand %p3949_p9, %p3943_p11 }
  0xd7   : > { %3953 = shalt.err (!%p3950_p12)
}
  0xd8   : > { %3521 = dma.hbm_to_vmem [thread:$0]  (!%p4849_p0), %s4389_s24, 256, %s4392_s20, %s4271_s7, %s4844_s26, %s4844_s26, %s4843_s17  }
  0xd9   : > { %p4850_p8 = scmp.ne.s32.totalorder %s4830_s25, 0 }
  0xda   : > { %s4422_s11 = sand.u32 (!%p4850_p8), 1, %s4024_s18   ;;  %p4851_p10 = scmp.ne.s32.totalorder (!%p4850_p8), %s4827_s23, 0 }
  0xdb   : > { %451 = sbr.rel (%p4850_p8) target bundleno = 3797 (0xed5), region = 64  ;;  %s4425_s28 = sshll.u32 (!%p4850_p8), %s4422_s11, 4 }
  0xdc   : > { %s454_s27 = scalar_lea.sflag (!%p4850_p8), [#allocation3], %s4422_s11  ;;  %s457_s15 = scalar_lea.vmem (!%p4850_p8), [#allocation2], %s4425_s28 }
  0xe2   : > { %3999 = dma.done.wait (%p4851_p10), %s454_s27, 256  }
  0xe3   : > { %4001 = vsyncadd (%p4851_p10), %s454_s27, 4294967040  ;;  %s462_s7 = sand.u32 1, %s4134_s21   ;;  %s466_s17 = scalar_lea.vmem [#allocation5], %s4425_s28 }
  0xe4   : > { %s463_s25 = scalar_lea.sflag [#allocation6], %s462_s7 }
  0xe5   : > { %4003 = dma.done.wait (%p4851_p10), %s463_s25, 512  }
  0xe6   : > { %4005 = vsyncadd (%p4851_p10), %s463_s25, 4294966784  ;;  %s475_s26 = scalar_lea.vmem [#allocation7], %s4425_s28  ;;  %p4852_p0 = scmp.eq.s32.totalorder %s4134_s21, 0 }
  0xe8   : > { %4007 = dma.done.wait (%p4852_p0), [#allocation9], 4096   ;;  %p4853_p1 = pmov %p4852_p0 }
  0xe9   : > { %p4854_p6 = pmov %p4852_p0 }
  0xea   : > { %4009 = vsyncadd (%p4853_p1), [#allocation9], 4294963200 }
  0xeb   : > { %4011 = dma.done.wait (%p4854_p6), [#allocation12], 4096   ;;  %p4855_p3 = pmov %p4852_p0 }
  0xec   : > { %v644_v0 = vld [vmem:[#allocation10] sm:$0xff]  ;;  %v645_v1 = vld [vmem:[#allocation10 + $0x8] sm:$0xff]  ;;  %v646_v2 = vld [vmem:[#allocation10 + $0x10] sm:$0xff]  ;;  %vm840_vm0 = vcmask 130048   ;;  %s4856_s20 = sld [smem:[#allocation28_spill]]  ;;  %s4043_s3 = smov 112  }
  0xed   : > { %4013 = vsyncadd (%p4855_p3), [#allocation12], 4294963200  ;;  %v3299_v3 = vpack.c.bf16 %v645_v1, %v644_v0  ;;  %v647_v4 = vld [vmem:[#allocation10 + $0x18] sm:$0xff]  ;;  %v546_v5 = vld [vmem:[#allocation8] sm:$0xff]  ;;  %s4859_s14 = sld [smem:[#allocation30_spill]]  ;;  %s4044_s8 = smov 80  }
  0xee   : > { %v547_v6 = vld [vmem:[#allocation8 + $0x8] sm:$0xff]  ;;  %v3303_v7 = vpack.c.bf16 %v647_v4, %v646_v2  ;;  %v648_v9 = vld [vmem:[#allocation10 + $0x20] sm:$0xff]  ;;  %v548_v11 = vld [vmem:[#allocation8 + $0x10] sm:$0xff]  ;;  %s4045_s12 = smov 96   ;;  %s4046_s30 = smov 64   ;;  %vm2507_vm2 = vcmask 261120  }
  0xef   : > { %v3267_v8 = vpack.c.bf16 %v547_v6, %v546_v5  ;;  %v649_v10 = vld [vmem:[#allocation10 + $0x28] sm:$0xff]  ;;  %3300 = vmatprep.subr.bf16.mxu1 %v3299_v3  ;;  %v549_v12 = vld [vmem:[#allocation8 + $0x18] sm:$0xff]  ;;  %v550_v14 = vld [vmem:[#allocation8 + $0x20] sm:$0xff]  ;;  %s4047_s1 = smov 32   ;;  %s4048_s22 = smov 48   ;;  %vm2510_vm3 = vcmask 392192  }
  0xf0   : > { %3302 = vmatpush3.bf16.msra.mxu1 %v3299_v3  ;;  %v3271_v13 = vpack.c.bf16 %v549_v12, %v548_v11  ;;  %v551_v15 = vld [vmem:[#allocation8 + $0x28] sm:$0xff]  ;;  %v3307_v16 = vpack.c.bf16 %v649_v10, %v648_v9  ;;  %v650_v17 = vld [vmem:[#allocation10 + $0x30] sm:$0xff]  ;;  %v651_v18 = vld [vmem:[#allocation10 + $0x38] sm:$0xff]  ;;  %s4049_s13 = smov 16   ;;  %vm2513_vm4 = vcmask 523264   ;;  %vm2516_vm5 = vcmask 654336  }
  0xf1   : > { %3268 = vmatprep.subr.bf16.mxu0 %v3267_v8  ;;  %3304 = vmatprep.subr.bf16.mxu1 %v3303_v7  ;;  %v3275_v19 = vpack.c.bf16 %v551_v15, %v550_v14  ;;  %v552_v20 = vld [vmem:[#allocation8 + $0x30] sm:$0xff]  ;;  %v553_v21 = vld [vmem:[#allocation8 + $0x38] sm:$0xff]  ;;  %v3311_v22 = vpack.c.bf16 %v651_v18, %v650_v17  ;;  %v652_v24 = vld [vmem:[#allocation10 + $0x40] sm:$0xff]  ;;  %vm2519_vm6 = vcmask 785408   ;;  %vm2522_vm7 = vcmask 916480   ;;  %s4860_s27 = sld [smem:[#allocation24_spill]] }
  0xf2   : > { %3270 = vmatpush3.bf16.msra.mxu0 %v3267_v8  ;;  %v542_v23 = vld [vmem:[%s466_s17] sm:$0xff]  ;;  %v653_v25 = vld [vmem:[#allocation10 + $0x48] sm:$0xff]  ;;  %v3279_v26 = vpack.c.bf16 %v553_v21, %v552_v20  ;;  %v655_v32 = vld [vmem:[#allocation10 + $0x58] sm:$0xff]  ;;  %s2878_s23 = sshll.u32 %s4134_s21, 8  ;;  %s4862_s10 = sld [smem:[#allocation32_spill]] }
  0xf3   : > { %3272 = vmatprep.subr.bf16.mxu0 %v3271_v13  ;;  %3082 = vmatprep.mubr.f32.mxu1 %v542_v23  ;;  %v554_v27 = vld [vmem:[#allocation8 + $0x40] sm:$0xff]  ;;  %v555_v28 = vld [vmem:[#allocation8 + $0x48] sm:$0xff]  ;;  %v3315_v30 = vpack.c.bf16 %v653_v25, %v652_v24  ;;  %v654_v31 = vld [vmem:[#allocation10 + $0x50] sm:$0xff]  ;;  %s4050_s21 = smov [#allocation14]  }
  0xf4   : > { %3306 = vmatpush3.bf16.msra.mxu1 %v3303_v7  ;;  %v540_v29 = vld [vmem:[%s457_s15] sm:$0xff]  ;;  %v3283_v33 = vpack.c.bf16 %v555_v28, %v554_v27  ;;  %v557_v35 = vld [vmem:[#allocation8 + $0x58] sm:$0xff]  ;;  %v3319_v36 = vpack.c.bf16 %v655_v32, %v654_v31  ;;  %v657_v38 = vld [vmem:[#allocation10 + $0x68] sm:$0xff]  ;;  %s3958_s4 = sshll.u32 %s4050_s21, 4  ;;  %s3959_s4 = int_to_ptr.vmem [resolvable:$false] %s3958_s4 }
  0xf5   : > { %3308 = vmatprep.subr.bf16.mxu1 %v3307_v16  ;;  %3047 = vmatprep.mubr.f32.mxu0 %v540_v29  ;;  %v556_v34 = vld [vmem:[#allocation8 + $0x50] sm:$0xff]  ;;  %v656_v37 = vld [vmem:[#allocation10 + $0x60] sm:$0xff]  ;;  %v559_v41 = vld [vmem:[#allocation8 + $0x68] sm:$0xff]  ;;  %s3960_s16 = scalar_lea.vmem %s3959_s4, 512 }
  0xf6   : > { %3274 = vmatpush3.bf16.msra.mxu0 %v3271_v13  ;;  %v3287_v39 = vpack.c.bf16 %v557_v35, %v556_v34  ;;  %v558_v40 = vld [vmem:[#allocation8 + $0x60] sm:$0xff]  ;;  %v3323_v42 = vpack.c.bf16 %v657_v38, %v656_v37  ;;  %v658_v43 = vld [vmem:[#allocation10 + $0x70] sm:$0xff]  ;;  %v659_v44 = vld [vmem:[#allocation10 + $0x78] sm:$0xff] }
  0xf7   : > { %3276 = vmatprep.subr.bf16.mxu0 %v3275_v19  ;;  %v3291_v45 = vpack.c.bf16 %v559_v41, %v558_v40  ;;  %v560_v46 = vld [vmem:[#allocation8 + $0x70] sm:$0xff]  ;;  %v561_v47 = vld [vmem:[#allocation8 + $0x78] sm:$0xff]  ;;  %v3327_v48 = vpack.c.bf16 %v659_v44, %v658_v43  ;;  %v742_v52 = vld [vmem:[#allocation11] sm:$0xff]  ;;  %p4863_p2 = scmp.ne.s32.totalorder %s4860_s27, 0 }
  0xf8   : > { %3310 = vmatpush3.bf16.msra.mxu1 %v3307_v16  ;;  %v3295_v49 = vpack.c.bf16 %v561_v47, %v560_v46  ;;  %v543_v50 = vld [vmem:[%s466_s17 + $0x8] sm:$0xff]  ;;  %v744_v54 = vld [vmem:[#allocation11 + $0x10] sm:$0xff]  ;;  %v746_v58 = vld [vmem:[#allocation11 + $0x20] sm:$0xff] }
  0xf9   : > { %3312 = vmatprep.subr.bf16.mxu1 %v3311_v22  ;;  %v541_v51 = vld [vmem:[%s457_s15 + $0x8] sm:$0xff]  ;;  %v544_v61 = vld [vmem:[%s475_s26] sm:$0xff]  ;;  %vm4466_vm1 = vmpackc.low %vm840_vm0, %vm840_vm0  ;;  %s539_s15 = scalar_lea.vmem [#allocation14], %s4425_s28  ;;  %s2626_s28 = scalar_lea.sflag [#allocation4], %s4422_s11 }
  0xfa   : > { %3278 = vmatpush3.bf16.msra.mxu0 %v3275_v19  ;;  %v743_v53 = vld [vmem:[#allocation11 + $0x8] sm:$0xff]  ;;  %v745_v56 = vld [vmem:[#allocation11 + $0x18] sm:$0xff]  ;;  %v748_v62 = vld [vmem:[#allocation11 + $0x30] sm:$0xff]  ;;  %s2639_s7 = sshll.u32 %s539_s15, 4  ;;  %s4732_s7 = int_to_ptr.vmem [resolvable:$true] %s2639_s7 }
  0xfb   : > { %3280 = vmatprep.subr.bf16.mxu0 %v3279_v26  ;;  %v3331_v55 = vpack.c.bf16 %v743_v53, %v742_v52  ;;  %v3335_v57 = vpack.c.bf16 %v745_v56, %v744_v54  ;;  %v747_v59 = vld [vmem:[#allocation11 + $0x28] sm:$0xff]  ;;  %v749_v63 = vld [vmem:[#allocation11 + $0x38] sm:$0xff]  ;;  %v2819_v0 = vld [vmem:[%s4787_s6] ss:$0 sm:$0xff]  ;;  %p3961_p13 = scmp.lt.s32.totalorder %s4732_s7, %s3959_s4 }
  0xfc   : > { %3314 = vmatpush3.bf16.msra.mxu1 %v3311_v22  ;;  %v3339_v60 = vpack.c.bf16 %v747_v59, %v746_v58  ;;  %v2818_v2 = vld [vmem:[%s4856_s20] ss:$0 sm:$0xff]  ;;  %v3343_v3 = vpack.c.bf16 %v749_v63, %v748_v62  ;;  %v751_v5 = vld [vmem:[#allocation11 + $0x48] sm:$0xff]  ;;  %v752_v16 = vld [vmem:[#allocation11 + $0x50] sm:$0xff]  ;;  %s4737_s20 = scalar_lea.hbm %s4862_s10, %s2878_s23 }
  0xfd   : > { %3316 = vmatprep.subr.bf16.mxu1 %v3315_v30  ;;  %v750_v4 = vld [vmem:[#allocation11 + $0x40] sm:$0xff]  ;;  %v753_v17 = vld [vmem:[#allocation11 + $0x58] sm:$0xff]  ;;  %v755_v20 = vld [vmem:[#allocation11 + $0x68] sm:$0xff] }
  0xfe   : > { %3282 = vmatpush3.bf16.msra.mxu0 %v3279_v26  ;;  %v3347_v13 = vpack.c.bf16 %v751_v5, %v750_v4  ;;  %v3351_v18 = vpack.c.bf16 %v753_v17, %v752_v16  ;;  %v754_v19 = vld [vmem:[#allocation11 + $0x60] sm:$0xff]  ;;  %v756_v23 = vld [vmem:[#allocation11 + $0x70] sm:$0xff]  ;;  %v757_v24 = vld [vmem:[#allocation11 + $0x78] sm:$0xff] }
  0xff   : > { %3284 = vmatprep.subr.bf16.mxu0 %v3283_v33  ;;  %v3355_v22 = vpack.c.bf16 %v755_v20, %v754_v19  ;;  %v3359_v25 = vpack.c.bf16 %v757_v24, %v756_v23  ;;  %v545_v26 = vld [vmem:[%s475_s26 + $0x8] sm:$0xff]  ;;  %v2820_v34 = vld [vmem:[%s4859_s14] ss:$0 sm:$0xff]  ;;  %s4861_s26 = sld [smem:[#allocation31_spill]] }
 0x100   : > { %3318 = vmatpush3.bf16.msra.mxu1 %v3315_v30 }
 0x101   : > { %3320 = vmatprep.subr.bf16.mxu1 %v3319_v36 }
 0x102   : > { %3286 = vmatpush3.bf16.msra.mxu0 %v3283_v33 }
 0x103   : > { %3288 = vmatprep.subr.bf16.mxu0 %v3287_v39 }
 0x104   : > { %3322 = vmatpush3.bf16.msra.mxu1 %v3319_v36 }
 0x105   : > { %3324 = vmatprep.subr.bf16.mxu1 %v3323_v42 }
 0x106   : > { %3290 = vmatpush3.bf16.msra.mxu0 %v3287_v39 }
 0x107   : > { %3292 = vmatprep.subr.bf16.mxu0 %v3291_v45 }
 0x108   : > { %3326 = vmatpush3.bf16.msra.mxu1 %v3323_v42 }
 0x109   : > { %3328 = vmatprep.subr.bf16.mxu1 %v3327_v48 }
 0x10a   : > { %3294 = vmatpush3.bf16.msra.mxu0 %v3291_v45 }
 0x10b   : > { %3296 = vmatprep.subr.bf16.mxu0 %v3295_v49 }
 0x10c   : > { %3330 = vmatpush3.bf16.msra.mxu1 %v3327_v48 }
 0x10e   : > { %3298 = vmatpush3.bf16.msra.mxu0 %v3295_v49 }
 0x10f   : > { %3083 = vmatmul.mubr.f32.vlgmr.msra.gmra.mrb[0].mxu1 %v543_v50  ;;  %3332 = vmatprep.subr.bf16.mxu0 %v3331_v55 }
 0x111   : > { %3048 = vmatmul.mubr.f32.vlgmr.msra.gmra.mrb[0].mxu0 %v541_v51 }
 0x112   : > { %3334 = vmatpush3.bf16.msra.mxu0 %v3331_v55  ;;  %3117 = vmatprep.mubr.f32.mxu0 %v544_v61 }
 0x113   : > { %3336 = vmatprep.subr.bf16.mxu0 %v3335_v57 }
 0x116   : > { %3338 = vmatpush3.bf16.msra.mxu0 %v3335_v57 }
 0x117   : > { %3340 = vmatprep.subr.bf16.mxu0 %v3339_v60 }
 0x11a   : > { %3342 = vmatpush3.bf16.msra.mxu0 %v3339_v60 }
 0x11b   : > { %3344 = vmatprep.subr.bf16.mxu0 %v3343_v3 }
 0x11e   : > { %3346 = vmatpush3.bf16.msra.mxu0 %v3343_v3 }
 0x11f   : > { %3348 = vmatprep.subr.bf16.mxu0 %v3347_v13 }
 0x122   : > { %3350 = vmatpush3.bf16.msra.mxu0 %v3347_v13 }
 0x123   : > { %3352 = vmatprep.subr.bf16.mxu0 %v3351_v18 }
 0x126   : > { %3354 = vmatpush3.bf16.msra.mxu0 %v3351_v18 }
 0x127   : > { %3356 = vmatprep.subr.bf16.mxu0 %v3355_v22 }
 0x12a   : > { %3358 = vmatpush3.bf16.msra.mxu0 %v3355_v22 }
 0x12b   : > { %3360 = vmatprep.subr.bf16.mxu0 %v3359_v25 }
 0x12e   : > { %3362 = vmatpush3.bf16.msra.mxu0 %v3359_v25 }
 0x131   : > { %3118 = vmatmul.mubr.f32.vlgmr.msra.gmra.mrb[2].mxu0 %v545_v26 }
 0x1e2   : > { %v3084_v1 = vpop.f32.mrb[0].mxu1 }
 0x1e3   : > { %v739_v6 = vadd.f32 %v3084_v1, %v2819_v0  ;;  %v733_v7 = vpop.f32.mrb[1].mxu1 }
 0x1e4   : > { %v3049_v8 = vpop.f32.mrb[0].mxu0  ;;  %v734_v9 = vadd.f32 %v2819_v0, %v733_v7 }
 0x1e5   : > { %v635_v10 = vpop.f32.mrb[1].mxu0  ;;  %v4482_v21 = vadd.f32 %v3049_v8, %v2818_v2 }
 0x1e6   : > { %v4470_v12 = vadd.f32 %v2818_v2, %v635_v10  ;;  %v3363_v14 = vpack.c.bf16 %v739_v6, %v734_v9  ;;  %v4472_v15 = vpack.i.bf16 %v739_v6, %v734_v9 }
 0x1e8   : > { %1033 = vrot.lane.b32.xlu1 %v4470_v12, %s4043_s3  ;;  %3124 = vmatprep.mubr.msk.f32.mxu1 %vm840_vm0, %v4470_v12 }
 0x1e9   : > { %3365 = vmatprep.subr.msk.bf16.mxu1 %vm4466_vm1, %v3363_v14 }
 0x1ea   : > { %3368 = vmatpush3.bf16.xpose.msk.msra.mxu1 %vm4466_vm1, %v3363_v14 }
 0x1f1   : > { %3125 = vmatmul.mubr.msk.f32.vlgmr.msra.gmra.mrb[2].mxu1 %vm840_vm0, %v4482_v21 }
 0x204   : > { %v3119_v33 = vpop.f32.mrb[2].mxu0 }
 0x205   : > { %v831_v35 = vpop.f32.mrb[3].mxu0  ;;  %v837_v36 = vadd.f32 %v3119_v33, %v2820_v34 }
 0x206   : > { %v832_v37 = vadd.f32 %v2820_v34, %v831_v35 }
 0x208   : > { %v3369_v38 = vpack.c.bf16 %v837_v36, %v832_v37  ;;  %v4513_v5 = vpack.i.bf16 %v837_v36, %v832_v37 }
 0x20a   : > { %3370 = vmatprep.subr.bf16.mxu1 %v3369_v38 }
 0x20b   : > { %3372 = vmatpush3.bf16.msra.mxu1 %v3369_v38 }
 0x25a   : > { %v1034_v53 = vpop.permute.xlu1 %1033 }
 0x2c4   : > { %v3126_v27 = vpop.f32.mrb[2].mxu1 }
 0x2c5   : > { %v919_v28 = vpop.f32.mrb[3].mxu1  ;;  %v929_v30 = vmul.f32 0.25, %v3126_v27 }
 0x2c6   : > { %v928_v29 = vmul.f32 0.25, %v919_v28 }
 0x2c7   : > { %v933_v32 = vsel %vm840_vm0, %v929_v30, -inf }
 0x2c8   : > { %v930_v31 = vsel %vm840_vm0, %v928_v29, -inf }
 0x2c9   : > { %931 = vmax.xlane.f32.xlu0 %v930_v31 }
 0x2cd   : > { %934 = vmax.xlane.f32.xlu0 %v933_v32 }
 0x2e3   : > { %3584 = vrot.lane.b32.xlu0 %v4472_v15, %s4043_s3 }
 0x356   : > { %v932_v39 = vpop.xlane.xlu0 %931 }
 0x357   : > { %v936_v40 = vsub.f32 %v928_v29, %v932_v39 }
 0x359   : > { %v938_v43 = vmul.f32 1.442695, %v936_v40 }
 0x35a   : > { %v935_v41 = vpop.xlane.xlu0 %934 }
 0x35b   : > { %v937_v42 = vsub.f32 %v929_v30, %v935_v41 }
 0x35d   : > { %v940_v44 = vmul.f32 1.442695, %v937_v42 }
 0x35e   : > { %v3585_v45 = vpop.permute.xlu0 %3584 }
 0x35f   : > { %3688 = vpow2.f32 %v940_v44  ;;  %v3587_v46 = vunpack.i.h.bf16 %v3585_v45  ;;  %v3586_v47 = vunpack.i.l.bf16 %v3585_v45 }
 0x360   : > { %3690 = vpow2.f32 %v938_v43 }
 0x361   : > { %v3373_v48 = vpack.c.bf16 %v3587_v46, %v3586_v47 }
 0x363   : > { %3375 = vmatprep.subr.msk.bf16.mxu1 %vm4466_vm1, %v3373_v48 }
 0x369   : > { %v3689_v49 = vpop.eup %3688 }
 0x36a   : > { %v945_v50 = vsel %vm840_vm0, %v3689_v49, 0.0  ;;  %v3691_v51 = vpop.eup %3690 }
 0x36b   : > { %946 = vadd.xlane.f32.xlu1 %v945_v50  ;;  %v942_v52 = vsel %vm840_vm0, %v3691_v51, 0.0 }
 0x36f   : > { %943 = vadd.xlane.f32.xlu1 %v942_v52 }
 0x380   : > { %1035 = vrot.lane.b32.xlu1 %v4482_v21, %s4043_s3 }
 0x3f8   : > { %v947_v54 = vpop.xlane.xlu1 %946 }
 0x3f9   : > { %3692 = vrcp.f32 %v947_v54 }
 0x3fc   : > { %v944_v55 = vpop.xlane.xlu1 %943 }
 0x3fd   : > { %3694 = vrcp.f32 %v944_v55 }
 0x400   : > { %v1036_v60 = vpop.permute.xlu1 %1035 }
 0x403   : > { %v3693_v56 = vpop.eup %3692 }
 0x404   : > { %v951_v59 = vmul.f32 %v3693_v56, %v3689_v49 }
 0x407   : > { %v3695_v57 = vpop.eup %3694 }
 0x408   : > { %v950_v58 = vmul.f32 %v3695_v57, %v3691_v51 }
 0x40a   : > { %3131 = vmatprep.mubr.msk.f32.mxu1 %vm840_vm0, %v950_v58 }
 0x40b   : > { %3132 = vmatmul.mubr.msk.f32.vlgmr.msra.gmra.mrb[4].mxu1 %vm840_vm0, %v951_v59 }
 0x40c   : > { %3378 = vmatpush3.bf16.xpose.msk.msra.mxu1 %vm4466_vm1, %v3373_v48  ;;  %3138 = vmatprep.mubr.msk.f32.mxu1 %vm840_vm0, %v1034_v53 }
 0x413   : > { %3139 = vmatmul.mubr.msk.f32.vlgmr.msra.gmra.mrb[6].mxu1 %vm840_vm0, %v1036_v60 }
 0x4de   : > { %v4507_v61 = vpop.f32.mrb[4].mxu1 }
 0x4df   : > { %v4509_v62 = vpop.f32.mrb[5].mxu1 }
 0x4e6   : > { %v3140_v63 = vpop.f32.mrb[6].mxu1 }
 0x4e7   : > { %v1125_v0 = vmul.f32 0.25, %v3140_v63  ;;  %v1115_v1 = vpop.f32.mrb[7].mxu1 }
 0x4e8   : > { %v1124_v2 = vmul.f32 0.25, %v1115_v1 }
 0x4e9   : > { %v1129_v3 = vsel %vm840_vm0, %v1125_v0, -inf }
 0x4ea   : > { %1130 = vmax.xlane.f32.xlu0 %v1129_v3  ;;  %v1126_v4 = vsel %vm840_vm0, %v1124_v2, -inf }
 0x4eb   : > { %1127 = vmax.xlane.f32.xlu1 %v1126_v4 }
 0x4fc   : > { %3589 = vrot.lane.b32.xlu1 %v4513_v5, %s4043_s3 }
 0x500   : > { %3599 = vrot.lane.b32.xlu1 %v4472_v15, %s4044_s8 }
 0x504   : > { %1237 = vrot.lane.b32.xlu1 %v4470_v12, %s4045_s12 }
 0x508   : > { %1239 = vrot.lane.b32.xlu1 %v4482_v21, %s4045_s12 }
 0x50c   : > { %1439 = vrot.lane.b32.xlu1 %v4470_v12, %s4044_s8 }
 0x510   : > { %1641 = vrot.lane.b32.xlu1 %v4470_v12, %s4046_s30 }
 0x577   : > { %v1131_v6 = vpop.xlane.xlu0 %1130 }
 0x578   : > { %v1133_v7 = vsub.f32 %v1125_v0, %v1131_v6  ;;  %v1128_v8 = vpop.xlane.xlu1 %1127 }
 0x579   : > { %v1132_v9 = vsub.f32 %v1124_v2, %v1128_v8 }
 0x57a   : > { %v1136_v10 = vmul.f32 1.442695, %v1133_v7 }
 0x57b   : > { %v1134_v13 = vmul.f32 1.442695, %v1132_v9 }
 0x57c   : > { %3696 = vpow2.f32 %v1136_v10  ;;  %v3590_v14 = vpop.permute.xlu1 %3589 }
 0x57d   : > { %v3592_v16 = vunpack.i.h.bf16 %v3590_v14  ;;  %v3591_v17 = vunpack.i.l.bf16 %v3590_v14  ;;  %3698 = vpow2.f32 %v1134_v13 }
 0x57f   : > { %v3379_v18 = vpack.c.bf16 %v3592_v16, %v3591_v17 }
 0x580   : > { %v3600_v27 = vpop.permute.xlu1 %3599 }
 0x581   : > { %3380 = vmatprep.subr.bf16.mxu1 %v3379_v18  ;;  %v3602_v33 = vunpack.i.h.bf16 %v3600_v27  ;;  %v3601_v34 = vunpack.i.l.bf16 %v3600_v27 }
 0x582   : > { %3382 = vmatpush3.bf16.msra.mxu1 %v3379_v18 }
 0x583   : > { %v3393_v38 = vpack.c.bf16 %v3602_v33, %v3601_v34 }
 0x584   : > { %v1238_v35 = vpop.permute.xlu1 %1237 }
 0x586   : > { %v3697_v19 = vpop.eup %3696 }
 0x587   : > { %v1141_v20 = vsel %vm840_vm0, %v3697_v19, 0.0  ;;  %v3699_v22 = vpop.eup %3698 }
 0x588   : > { %1142 = vadd.xlane.f32.xlu0 %v1141_v20  ;;  %v1138_v23 = vsel %vm840_vm0, %v3699_v22, 0.0  ;;  %v1240_v40 = vpop.permute.xlu1 %1239 }
 0x58c   : > { %1139 = vadd.xlane.f32.xlu0 %v1138_v23  ;;  %v1440_v43 = vpop.permute.xlu1 %1439 }
 0x590   : > { %v1642_v46 = vpop.permute.xlu1 %1641 }
 0x5a2   : > { %3594 = vrot.lane.b32.xlu0 %v4472_v15, %s4045_s12 }
 0x5a6   : > { %3604 = vrot.lane.b32.xlu0 %v4472_v15, %s4046_s30 }
 0x5aa   : > { %1441 = vrot.lane.b32.xlu0 %v4482_v21, %s4044_s8 }
 0x5ae   : > { %1643 = vrot.lane.b32.xlu0 %v4482_v21, %s4046_s30 }
 0x615   : > { %v1143_v24 = vpop.xlane.xlu0 %1142 }
 0x616   : > { %3700 = vrcp.f32 %v1143_v24 }
 0x619   : > { %v1140_v25 = vpop.xlane.xlu0 %1139 }
 0x61a   : > { %3702 = vrcp.f32 %v1140_v25 }
 0x61d   : > { %v3595_v26 = vpop.permute.xlu0 %3594 }
 0x61e   : > { %v3597_v28 = vunpack.i.h.bf16 %v3595_v26  ;;  %v3596_v29 = vunpack.i.l.bf16 %v3595_v26 }
 0x620   : > { %v3383_v30 = vpack.c.bf16 %v3597_v28, %v3596_v29  ;;  %v3701_v31 = vpop.eup %3700 }
 0x621   : > { %v1147_v37 = vmul.f32 %v3701_v31, %v3697_v19  ;;  %v3605_v39 = vpop.permute.xlu0 %3604 }
 0x622   : > { %3385 = vmatprep.subr.msk.bf16.mxu1 %vm4466_vm1, %v3383_v30  ;;  %v3607_v41 = vunpack.i.h.bf16 %v3605_v39  ;;  %v3606_v42 = vunpack.i.l.bf16 %v3605_v39 }
 0x624   : > { %v3703_v32 = vpop.eup %3702  ;;  %v3403_v44 = vpack.c.bf16 %v3607_v41, %v3606_v42 }
 0x625   : > { %v1146_v36 = vmul.f32 %v3703_v32, %v3699_v22  ;;  %v1442_v45 = vpop.permute.xlu0 %1441 }
 0x627   : > { %3145 = vmatprep.mubr.msk.f32.mxu1 %vm840_vm0, %v1146_v36 }
 0x628   : > { %3146 = vmatmul.mubr.msk.f32.vlgmr.msra.gmra.mrb[8].mxu1 %vm840_vm0, %v1147_v37 }
 0x629   : > { %3388 = vmatpush3.bf16.xpose.msk.msra.mxu1 %vm4466_vm1, %v3383_v30  ;;  %3152 = vmatprep.mubr.msk.f32.mxu1 %vm840_vm0, %v1238_v35  ;;  %v1644_v47 = vpop.permute.xlu0 %1643 }
 0x62a   : > { %3395 = vmatprep.subr.msk.bf16.mxu1 %vm4466_vm1, %v3393_v38 }
 0x630   : > { %3153 = vmatmul.mubr.msk.f32.vlgmr.msra.gmra.mrb[10].mxu1 %vm840_vm0, %v1240_v40 }
 0x631   : > { %3398 = vmatpush3.bf16.xpose.msk.msra.mxu1 %vm4466_vm1, %v3393_v38  ;;  %3166 = vmatprep.mubr.msk.f32.mxu1 %vm840_vm0, %v1440_v43 }
 0x632   : > { %3405 = vmatprep.subr.msk.bf16.mxu1 %vm4466_vm1, %v3403_v44 }
 0x638   : > { %3167 = vmatmul.mubr.msk.f32.vlgmr.msra.gmra.mrb[12].mxu1 %vm840_vm0, %v1442_v45 }
 0x639   : > { %3408 = vmatpush3.bf16.xpose.msk.msra.mxu1 %vm4466_vm1, %v3403_v44  ;;  %3180 = vmatprep.mubr.msk.f32.mxu1 %vm840_vm0, %v1642_v46 }
 0x640   : > { %3181 = vmatmul.mubr.msk.f32.vlgmr.msra.gmra.mrb[14].mxu1 %vm840_vm0, %v1644_v47 }
 0x6fb   : > { %v4557_v48 = vpop.f32.mrb[8].mxu1 }
 0x6fc   : > { %v4559_v49 = vpop.f32.mrb[9].mxu1 }
 0x6fd   : > { %v3653_v50 = vpack.i.bf16 %v4557_v48, %v4559_v49 }
 0x703   : > { %v4563_v51 = vpop.f32.mrb[10].mxu1 }
 0x704   : > { %v4565_v52 = vpop.f32.mrb[11].mxu1  ;;  %v4618_v47 = vmul.f32 0.25, %v4563_v51 }
 0x70b   : > { %v4567_v53 = vpop.f32.mrb[12].mxu1 }
 0x70c   : > { %v4569_v54 = vpop.f32.mrb[13].mxu1 }
 0x713   : > { %v3182_v55 = vpop.f32.mrb[14].mxu1 }
 0x714   : > { %v1733_v56 = vmul.f32 0.25, %v3182_v55  ;;  %v1723_v57 = vpop.f32.mrb[15].mxu1 }
 0x715   : > { %v1732_v58 = vmul.f32 0.25, %v1723_v57 }
 0x716   : > { %v1737_v59 = vsel %vm840_vm0, %v1733_v56, -inf }
 0x717   : > { %1738 = vmax.xlane.f32.xlu0 %v1737_v59  ;;  %v1734_v60 = vsel %vm840_vm0, %v1732_v58, -inf }
 0x718   : > { %1735 = vmax.xlane.f32.xlu1 %v1734_v60 }
 0x729   : > { %3609 = vrot.lane.b32.xlu1 %v4513_v5, %s4046_s30 }
 0x72d   : > { %3619 = vrot.lane.b32.xlu1 %v4472_v15, %s4047_s1 }
 0x731   : > { %1843 = vrot.lane.b32.xlu1 %v4470_v12, %s4048_s22 }
 0x735   : > { %1845 = vrot.lane.b32.xlu1 %v4482_v21, %s4048_s22 }
 0x739   : > { %2047 = vrot.lane.b32.xlu1 %v4482_v21, %s4047_s1 }
 0x7a4   : > { %v1739_v63 = vpop.xlane.xlu0 %1738 }
 0x7a5   : > { %v1741_v0 = vsub.f32 %v1733_v56, %v1739_v63  ;;  %v1736_v1 = vpop.xlane.xlu1 %1735  ;;  %v1333_v56 = vsel %vm840_vm0, %v4618_v47, -inf }
 0x7a6   : > { %v1740_v2 = vsub.f32 %v1732_v58, %v1736_v1 }
 0x7a7   : > { %v1744_v3 = vmul.f32 1.442695, %v1741_v0 }
 0x7a8   : > { %v1742_v4 = vmul.f32 1.442695, %v1740_v2  ;;  %v1328_v2 = vmul.f32 0.25, %v4565_v52 }
 0x7a9   : > { %3704 = vpow2.f32 %v1744_v3  ;;  %v3610_v6 = vpop.permute.xlu1 %3609  ;;  %v1530_v3 = vmul.f32 0.25, %v4569_v54 }
 0x7aa   : > { %v3612_v7 = vunpack.i.h.bf16 %v3610_v6  ;;  %v3611_v8 = vunpack.i.l.bf16 %v3610_v6  ;;  %3706 = vpow2.f32 %v1742_v4  ;;  %v1330_v4 = vsel %vm840_vm0, %v1328_v2, -inf }
 0x7ab   : > { %v1531_v6 = vmul.f32 0.25, %v4567_v53 }
 0x7ac   : > { %v3409_v9 = vpack.c.bf16 %v3612_v7, %v3611_v8  ;;  %v1532_v7 = vsel %vm840_vm0, %v1530_v3, -inf }
 0x7ad   : > { %v3620_v24 = vpop.permute.xlu1 %3619 }
 0x7ae   : > { %3410 = vmatprep.subr.bf16.mxu1 %v3409_v9  ;;  %v3622_v27 = vunpack.i.h.bf16 %v3620_v24  ;;  %v3621_v28 = vunpack.i.l.bf16 %v3620_v24 }
 0x7af   : > { %3412 = vmatpush3.bf16.msra.mxu1 %v3409_v9  ;;  %v1535_v9 = vsel %vm840_vm0, %v1531_v6, -inf }
 0x7b0   : > { %v3423_v31 = vpack.c.bf16 %v3622_v27, %v3621_v28 }
 0x7b1   : > { %v1844_v32 = vpop.permute.xlu1 %1843 }
 0x7b3   : > { %v3705_v10 = vpop.eup %3704 }
 0x7b4   : > { %v1749_v13 = vsel %vm840_vm0, %v3705_v10, 0.0  ;;  %v3707_v14 = vpop.eup %3706 }
 0x7b5   : > { %1750 = vadd.xlane.f32.xlu0 %v1749_v13  ;;  %v1746_v16 = vsel %vm840_vm0, %v3707_v14, 0.0  ;;  %v1846_v33 = vpop.permute.xlu1 %1845 }
 0x7b9   : > { %1747 = vadd.xlane.f32.xlu0 %v1746_v16  ;;  %v2048_v35 = vpop.permute.xlu1 %2047 }
 0x7cf   : > { %3614 = vrot.lane.b32.xlu0 %v4472_v15, %s4048_s22 }
 0x7d3   : > { %2045 = vrot.lane.b32.xlu0 %v4470_v12, %s4047_s1 }
 0x842   : > { %v1751_v17 = vpop.xlane.xlu0 %1750 }
 0x843   : > { %3708 = vrcp.f32 %v1751_v17 }
 0x846   : > { %v1748_v18 = vpop.xlane.xlu0 %1747 }
 0x847   : > { %3710 = vrcp.f32 %v1748_v18 }
 0x84a   : > { %v3615_v19 = vpop.permute.xlu0 %3614 }
 0x84b   : > { %v3617_v20 = vunpack.i.h.bf16 %v3615_v19  ;;  %v3616_v22 = vunpack.i.l.bf16 %v3615_v19 }
 0x84d   : > { %v3413_v23 = vpack.c.bf16 %v3617_v20, %v3616_v22  ;;  %v3709_v25 = vpop.eup %3708 }
 0x84e   : > { %v1755_v30 = vmul.f32 %v3709_v25, %v3705_v10  ;;  %v2046_v34 = vpop.permute.xlu0 %2045 }
 0x84f   : > { %3415 = vmatprep.subr.msk.bf16.mxu1 %vm4466_vm1, %v3413_v23 }
 0x851   : > { %v3711_v26 = vpop.eup %3710 }
 0x852   : > { %v1754_v29 = vmul.f32 %v3711_v26, %v3707_v14 }
 0x854   : > { %3187 = vmatprep.mubr.msk.f32.mxu1 %vm840_vm0, %v1754_v29 }
 0x855   : > { %3188 = vmatmul.mubr.msk.f32.vlgmr.msra.gmra.mrb[16].mxu1 %vm840_vm0, %v1755_v30 }
 0x856   : > { %3418 = vmatpush3.bf16.xpose.msk.msra.mxu1 %vm4466_vm1, %v3413_v23  ;;  %3194 = vmatprep.mubr.msk.f32.mxu1 %vm840_vm0, %v1844_v32 }
 0x857   : > { %3425 = vmatprep.subr.msk.bf16.mxu1 %vm4466_vm1, %v3423_v31 }
 0x85d   : > { %3195 = vmatmul.mubr.msk.f32.vlgmr.msra.gmra.mrb[18].mxu1 %vm840_vm0, %v1846_v33 }
 0x85e   : > { %3428 = vmatpush3.bf16.xpose.msk.msra.mxu1 %vm4466_vm1, %v3423_v31  ;;  %3208 = vmatprep.mubr.msk.f32.mxu1 %vm840_vm0, %v2046_v34 }
 0x865   : > { %3209 = vmatmul.mubr.msk.f32.vlgmr.msra.gmra.mrb[20].mxu1 %vm840_vm0, %v2048_v35 }
 0x928   : > { %v4603_v36 = vpop.f32.mrb[16].mxu1 }
 0x929   : > { %v4605_v37 = vpop.f32.mrb[17].mxu1 }
 0x92a   : > { %v3668_v38 = vpack.i.bf16 %v4603_v36, %v4605_v37 }
 0x930   : > { %v3196_v39 = vpop.f32.mrb[18].mxu1 }
 0x931   : > { %v1925_v40 = vpop.f32.mrb[19].mxu1  ;;  %v4620_v55 = vmul.f32 0.25, %v3196_v39 }
 0x932   : > { %v1934_v8 = vmul.f32 0.25, %v1925_v40 }
 0x933   : > { %v1939_v57 = vsel %vm840_vm0, %v4620_v55, -inf }
 0x934   : > { %v1936_v10 = vsel %vm840_vm0, %v1934_v8, -inf }
 0x938   : > { %v3210_v41 = vpop.f32.mrb[20].mxu1 }
 0x939   : > { %v2137_v42 = vmul.f32 0.25, %v3210_v41  ;;  %v2127_v43 = vpop.f32.mrb[21].mxu1 }
 0x93a   : > { %v2136_v44 = vmul.f32 0.25, %v2127_v43 }
 0x93b   : > { %v2141_v45 = vsel %vm840_vm0, %v2137_v42, -inf }
 0x93c   : > { %2142 = vmax.xlane.f32.xlu1 %v2141_v45  ;;  %v2138_v46 = vsel %vm840_vm0, %v2136_v44, -inf }
 0x93d   : > { %2139 = vmax.xlane.f32.xlu0 %v2138_v46 }
 0x94d   : > { %3629 = vrot.lane.b32.xlu1 %v4472_v15, %s4049_s13 }
 0x951   : > { %2247 = vrot.lane.b32.xlu1 %v4470_v12, %s4049_s13 }
 0x955   : > { %2249 = vrot.lane.b32.xlu1 %v4482_v21, %s4049_s13 }
 0x979   : > { %1334 = vmax.xlane.f32.xlu1 %v1333_v56 }
 0x97d   : > { %1940 = vmax.xlane.f32.xlu1 %v1939_v57 }
 0x9c9   : > { %v2143_v15 = vpop.xlane.xlu1 %2142 }
 0x9ca   : > { %v2145_v58 = vsub.f32 %v2137_v42, %v2143_v15  ;;  %v2140_v59 = vpop.xlane.xlu0 %2139 }
 0x9cb   : > { %v2144_v12 = vsub.f32 %v2136_v44, %v2140_v59 }
 0x9cc   : > { %v2148_v60 = vmul.f32 1.442695, %v2145_v58 }
 0x9cd   : > { %v2146_v63 = vmul.f32 1.442695, %v2144_v12  ;;  %v3630_v54 = vpop.permute.xlu1 %3629 }
 0x9ce   : > { %3712 = vpow2.f32 %v2148_v60  ;;  %v3632_v16 = vunpack.i.h.bf16 %v3630_v54  ;;  %v3631_v17 = vunpack.i.l.bf16 %v3630_v54 }
 0x9cf   : > { %3714 = vpow2.f32 %v2146_v63 }
 0x9d0   : > { %v3433_v20 = vpack.c.bf16 %v3632_v16, %v3631_v17 }
 0x9d1   : > { %v2248_v26 = vpop.permute.xlu1 %2247 }
 0x9d5   : > { %v2250_v27 = vpop.permute.xlu1 %2249 }
 0x9d8   : > { %v3713_v21 = vpop.eup %3712 }
 0x9d9   : > { %v2153_v51 = vsel %vm840_vm0, %v3713_v21, 0.0  ;;  %v3715_v0 = vpop.eup %3714 }
 0x9da   : > { %2154 = vadd.xlane.f32.xlu0 %v2153_v51  ;;  %v2150_v1 = vsel %vm840_vm0, %v3715_v0, 0.0 }
 0x9de   : > { %2151 = vadd.xlane.f32.xlu0 %v2150_v1 }
 0x9f4   : > { %3624 = vrot.lane.b32.xlu0 %v4513_v5, %s4047_s1 }
 0xa06   : > { %v1335_v30 = vpop.xlane.xlu1 %1334 }
 0xa07   : > { %v1337_v31 = vsub.f32 %v4618_v47, %v1335_v30 }
 0xa09   : > { %v1340_v35 = vmul.f32 1.442695, %v1337_v31 }
 0xa0a   : > { %v1941_v41 = vpop.xlane.xlu1 %1940 }
 0xa0b   : > { %v1943_v45 = vsub.f32 %v4620_v55, %v1941_v41 }
 0xa0d   : > { %v1946_v57 = vmul.f32 1.442695, %v1943_v45 }
 0xa13   : > { %1331 = vmax.xlane.f32.xlu0 %v1330_v4 }
 0xa17   : > { %1533 = vmax.xlane.f32.xlu0 %v1532_v7 }
 0xa1b   : > { %1536 = vmax.xlane.f32.xlu0 %v1535_v9 }
 0xa1f   : > { %1937 = vmax.xlane.f32.xlu0 %v1936_v10 }
 0xa67   : > { %v2155_v13 = vpop.xlane.xlu0 %2154 }
 0xa68   : > { %3716 = vrcp.f32 %v2155_v13 }
 0xa6b   : > { %v2152_v52 = vpop.xlane.xlu0 %2151 }
 0xa6c   : > { %3718 = vrcp.f32 %v2152_v52 }
 0xa6d   : > { %3720 = vpow2.f32 %v1340_v35 }
 0xa6f   : > { %v3625_v14 = vpop.permute.xlu0 %3624 }
 0xa70   : > { %v3627_v18 = vunpack.i.h.bf16 %v3625_v14  ;;  %v3626_v53 = vunpack.i.l.bf16 %v3625_v14 }
 0xa72   : > { %v3429_v19 = vpack.c.bf16 %v3627_v18, %v3626_v53  ;;  %v3717_v22 = vpop.eup %3716 }
 0xa73   : > { %v2159_v25 = vmul.f32 %v3717_v22, %v3713_v21 }
 0xa74   : > { %3430 = vmatprep.subr.bf16.mxu1 %v3429_v19 }
 0xa75   : > { %3432 = vmatpush3.bf16.msra.mxu1 %v3429_v19 }
 0xa76   : > { %v3719_v23 = vpop.eup %3718  ;;  %3435 = vmatprep.subr.msk.bf16.mxu1 %vm4466_vm1, %v3433_v20 }
 0xa77   : > { %v2158_v24 = vmul.f32 %v3719_v23, %v3715_v0  ;;  %v4654_v21 = vpop.eup %3720 }
 0xa78   : > { %v1345_v0 = vsel %vm840_vm0, %v4654_v21, 0.0 }
 0xa79   : > { %3215 = vmatprep.mubr.msk.f32.mxu1 %vm840_vm0, %v2158_v24 }
 0xa7a   : > { %3216 = vmatmul.mubr.msk.f32.vlgmr.msra.gmra.mrb[22].mxu1 %vm840_vm0, %v2159_v25 }
 0xa7b   : > { %3222 = vmatprep.mubr.msk.f32.mxu1 %vm840_vm0, %v2248_v26 }
 0xa7e   : > { %3438 = vmatpush3.bf16.xpose.msk.msra.mxu1 %vm4466_vm1, %v3433_v20 }
 0xa85   : > { %3223 = vmatmul.mubr.msk.f32.vlgmr.msra.gmra.mrb[24].mxu1 %vm840_vm0, %v2250_v27 }
 0xaa0   : > { %v1332_v28 = vpop.xlane.xlu0 %1331 }
 0xaa1   : > { %v1336_v33 = vsub.f32 %v1328_v2, %v1332_v28 }
 0xaa3   : > { %v1338_v42 = vmul.f32 1.442695, %v1336_v33 }
 0xaa4   : > { %v1534_v29 = vpop.xlane.xlu0 %1533 }
 0xaa5   : > { %v1538_v11 = vsub.f32 %v1530_v3, %v1534_v29  ;;  %3722 = vpow2.f32 %v1338_v42 }
 0xaa7   : > { %v1540_v47 = vmul.f32 1.442695, %v1538_v11 }
 0xaa8   : > { %v1537_v32 = vpop.xlane.xlu0 %1536 }
 0xaa9   : > { %v1539_v39 = vsub.f32 %v1531_v6, %v1537_v32 }
 0xaab   : > { %v1542_v46 = vmul.f32 1.442695, %v1539_v39 }
 0xaac   : > { %v1938_v44 = vpop.xlane.xlu0 %1937 }
 0xaad   : > { %v1942_v56 = vsub.f32 %v1934_v8, %v1938_v44  ;;  %3724 = vpow2.f32 %v1542_v46 }
 0xaae   : > { %3726 = vpow2.f32 %v1540_v47 }
 0xaaf   : > { %v1944_v15 = vmul.f32 1.442695, %v1942_v56  ;;  %3728 = vpow2.f32 %v1946_v57  ;;  %v3723_v51 = vpop.eup %3722 }
 0xab0   : > { %v1342_v2 = vsel %vm840_vm0, %v3723_v51, 0.0 }
 0xab1   : > { %3730 = vpow2.f32 %v1944_v15 }
 0xab7   : > { %v4659_v1 = vpop.eup %3724 }
 0xab8   : > { %v4662_v3 = vpop.eup %3726  ;;  %v1547_v4 = vsel %vm840_vm0, %v4659_v1, 0.0 }
 0xab9   : > { %v4666_v6 = vpop.eup %3728  ;;  %v1544_v7 = vsel %vm840_vm0, %v4662_v3, 0.0 }
 0xaba   : > { %v1951_v9 = vsel %vm840_vm0, %v4666_v6, 0.0 }
 0xabb   : > { %v4670_v8 = vpop.eup %3730 }
 0xabc   : > { %v1948_v10 = vsel %vm840_vm0, %v4670_v8, 0.0 }
 0xb4d   : > { %v4646_v34 = vpop.f32.mrb[22].mxu1 }
 0xb4e   : > { %v4648_v40 = vpop.f32.mrb[23].mxu1 }
 0xb4f   : > { %v3678_v43 = vpack.i.bf16 %v4646_v34, %v4648_v40 }
 0xb58   : > { %v3224_v58 = vpop.f32.mrb[24].mxu1 }
 0xb59   : > { %v2339_v59 = vmul.f32 0.25, %v3224_v58  ;;  %v2329_v12 = vpop.f32.mrb[25].mxu1 }
 0xb5a   : > { %v2338_v60 = vmul.f32 0.25, %v2329_v12 }
 0xb5b   : > { %v2343_v63 = vsel %vm840_vm0, %v2339_v59, -inf }
 0xb5c   : > { %2344 = vmax.xlane.f32.xlu1 %v2343_v63  ;;  %v2340_v55 = vsel %vm840_vm0, %v2338_v60, -inf }
 0xb5d   : > { %2341 = vmax.xlane.f32.xlu0 %v2340_v55 }
 0xb60   : > { %1346 = vadd.xlane.f32.xlu1 %v1345_v0 }
 0xb61   : > { %1343 = vadd.xlane.f32.xlu0 %v1342_v2 }
 0xb64   : > { %1548 = vadd.xlane.f32.xlu1 %v1547_v4  ;;  %v2525_v4 = vld [vmem:[#allocation13] sm:$0xff] }
 0xb65   : > { %1545 = vadd.xlane.f32.xlu0 %v1544_v7  ;;  %v2526_v7 = vld [vmem:[#allocation13 + $0x8] sm:$0xff] }
 0xb68   : > { %1952 = vadd.xlane.f32.xlu1 %v1951_v9  ;;  %v3443_v9 = vpack.c.bf16 %v2526_v7, %v2525_v4 }
 0xb69   : > { %1949 = vadd.xlane.f32.xlu0 %v1948_v10  ;;  %v2528_v10 = vld [vmem:[#allocation13 + $0x18] sm:$0xff] }
 0xbe9   : > { %v2345_v13 = vpop.xlane.xlu1 %2344 }
 0xbea   : > { %v2347_v52 = vsub.f32 %v2339_v59, %v2345_v13  ;;  %v2342_v54 = vpop.xlane.xlu0 %2341 }
 0xbeb   : > { %v2346_v14 = vsub.f32 %v2338_v60, %v2342_v54 }
 0xbec   : > { %v2350_v16 = vmul.f32 1.442695, %v2347_v52  ;;  %v2530_v52 = vld [vmem:[#allocation13 + $0x28] sm:$0xff] }
 0xbed   : > { %v2348_v17 = vmul.f32 1.442695, %v2346_v14  ;;  %v1347_v25 = vpop.xlane.xlu1 %1346  ;;  %v2531_v14 = vld [vmem:[#allocation13 + $0x30] sm:$0xff] }
 0xbee   : > { %3732 = vpow2.f32 %v2350_v16  ;;  %v1344_v18 = vpop.xlane.xlu0 %1343  ;;  %v2532_v16 = vld [vmem:[#allocation13 + $0x38] sm:$0xff] }
 0xbef   : > { %3734 = vpow2.f32 %v2348_v17  ;;  %v3455_v17 = vpack.c.bf16 %v2532_v16, %v2531_v14 }
 0xbf0   : > { %3736 = vrcp.f32 %v1344_v18  ;;  %v2533_v18 = vld [vmem:[#allocation13 + $0x40] sm:$0xff] }
 0xbf1   : > { %v1549_v26 = vpop.xlane.xlu1 %1548  ;;  %3738 = vrcp.f32 %v1347_v25  ;;  %v2538_v25 = vld [vmem:[#allocation13 + $0x68] sm:$0xff] }
 0xbf2   : > { %v1546_v27 = vpop.xlane.xlu0 %1545 }
 0xbf3   : > { %3740 = vrcp.f32 %v1546_v27 }
 0xbf4   : > { %3742 = vrcp.f32 %v1549_v26 }
 0xbf5   : > { %v1953_v28 = vpop.xlane.xlu1 %1952 }
 0xbf6   : > { %v1950_v29 = vpop.xlane.xlu0 %1949 }
 0xbf7   : > { %3744 = vrcp.f32 %v1950_v29 }
 0xbf8   : > { %v4676_v53 = vpop.eup %3732  ;;  %3746 = vrcp.f32 %v1953_v28 }
 0xbf9   : > { %v4678_v19 = vpop.eup %3734  ;;  %v2355_v20 = vsel %vm840_vm0, %v4676_v53, 0.0 }
 0xbfa   : > { %2356 = vadd.xlane.f32.xlu1 %v2355_v20  ;;  %v2352_v22 = vsel %vm840_vm0, %v4678_v19, 0.0  ;;  %v3737_v23 = vpop.eup %3736  ;;  %v2535_v20 = vld [vmem:[#allocation13 + $0x50] sm:$0xff] }
 0xbfb   : > { %2353 = vadd.xlane.f32.xlu0 %v2352_v22  ;;  %v1350_v24 = vmul.f32 %v3737_v23, %v3723_v51  ;;  %v2536_v22 = vld [vmem:[#allocation13 + $0x58] sm:$0xff] }
 0xbfc   : > { %v3463_v23 = vpack.c.bf16 %v2536_v22, %v2535_v20 }
 0xbfd   : > { %3159 = vmatprep.mubr.msk.f32.mxu0 %vm840_vm0, %v1350_v24  ;;  %v2537_v24 = vld [vmem:[#allocation13 + $0x60] sm:$0xff] }
 0xbfe   : > { %v3467_v26 = vpack.c.bf16 %v2538_v25, %v2537_v24 }
 0xc0b   : > { %3639 = vrot.lane.b32.xlu1 %v4513_v5, %s4044_s8 }
 0xc0f   : > { %3644 = vrot.lane.b32.xlu1 %v4513_v5, %s4048_s22 }
 0xc11   : > { %3634 = vrot.lane.b32.xlu0 %v4513_v5, %s4045_s12 }
 0xc13   : > { %3649 = vrot.lane.b32.xlu1 %v4513_v5, %s4049_s13 }
 0xc15   : > { %3654 = vrot.lane.b32.xlu0 %v3653_v50, %s4049_s13  ;;  %v3739_v50 = vpop.eup %3738 }
 0xc16   : > { %v3741_v42 = vpop.eup %3740  ;;  %v1351_v46 = vmul.f32 %v3739_v50, %v4654_v21 }
 0xc17   : > { %v3743_v56 = vpop.eup %3742  ;;  %v1552_v57 = vmul.f32 %v3741_v42, %v4662_v3 }
 0xc18   : > { %v3745_v15 = vpop.eup %3744  ;;  %v1553_v60 = vmul.f32 %v3743_v56, %v4659_v1 }
 0xc19   : > { %v3747_v63 = vpop.eup %3746  ;;  %v1956_v21 = vmul.f32 %v3745_v15, %v4670_v8  ;;  %v2527_v8 = vld [vmem:[#allocation13 + $0x10] sm:$0xff] }
 0xc1a   : > { %v1957_v0 = vmul.f32 %v3747_v63, %v4666_v6  ;;  %v3447_v13 = vpack.c.bf16 %v2528_v10, %v2527_v8  ;;  %v2529_v6 = vld [vmem:[#allocation13 + $0x20] sm:$0xff] }
 0xc1b   : > { %v3451_v54 = vpack.c.bf16 %v2530_v52, %v2529_v6  ;;  %v2869_v52 = vld [vmem:[%s4861_s26] ss:$0 sm:$0xff] }
 0xc87   : > { %v2357_v30 = vpop.xlane.xlu1 %2356 }
 0xc88   : > { %v2354_v31 = vpop.xlane.xlu0 %2353 }
 0xc89   : > { %3748 = vrcp.f32 %v2354_v31  ;;  %v2540_v31 = vld [vmem:[#allocation13 + $0x78] sm:$0xff] }
 0xc8a   : > { %3750 = vrcp.f32 %v2357_v30  ;;  %v2539_v30 = vld [vmem:[#allocation13 + $0x70] sm:$0xff] }
 0xc8b   : > { %v3640_v32 = vpop.permute.xlu1 %3639 }
 0xc8c   : > { %v3635_v33 = vpop.permute.xlu0 %3634  ;;  %v3642_v35 = vunpack.i.h.bf16 %v3640_v32  ;;  %v3641_v5 = vunpack.i.l.bf16 %v3640_v32  ;;  %v3471_v32 = vpack.c.bf16 %v2540_v31, %v2539_v30 }
 0xc8d   : > { %v3637_v39 = vunpack.i.h.bf16 %v3635_v33  ;;  %v3636_v41 = vunpack.i.l.bf16 %v3635_v33 }
 0xc8e   : > { %v3399_v11 = vpack.c.bf16 %v3642_v35, %v3641_v5 }
 0xc8f   : > { %v3389_v48 = vpack.c.bf16 %v3637_v39, %v3636_v41  ;;  %v3645_v49 = vpop.permute.xlu1 %3644 }
 0xc90   : > { %v3647_v44 = vunpack.i.h.bf16 %v3645_v49  ;;  %v3646_v45 = vunpack.i.l.bf16 %v3645_v49 }
 0xc91   : > { %3390 = vmatprep.subr.bf16.mxu0 %v3389_v48 }
 0xc92   : > { %3392 = vmatpush3.bf16.msra.mxu0 %v3389_v48  ;;  %v3419_v58 = vpack.c.bf16 %v3647_v44, %v3646_v45 }
 0xc93   : > { %v3650_v47 = vpop.permute.xlu1 %3649  ;;  %3400 = vmatprep.subr.bf16.mxu0 %v3399_v11  ;;  %v3749_v55 = vpop.eup %3748 }
 0xc94   : > { %v3652_v59 = vunpack.i.h.bf16 %v3650_v47  ;;  %v3651_v12 = vunpack.i.l.bf16 %v3650_v47  ;;  %v3751_v2 = vpop.eup %3750  ;;  %v2360_v3 = vmul.f32 %v3749_v55, %v4678_v19 }
 0xc95   : > { %3160 = vmatmul.mubr.msk.f32.vlgmr.msra.gmra.mrb[4].mxu0 %vm840_vm0, %v1351_v46  ;;  %v2361_v1 = vmul.f32 %v3751_v2, %v4676_v53  ;;  %v2534_v53 = vld [vmem:[#allocation13 + $0x48] sm:$0xff] }
 0xc96   : > { %3402 = vmatpush3.bf16.msra.mxu0 %v3399_v11  ;;  %3173 = vmatprep.mubr.msk.f32.mxu0 %vm840_vm0, %v1552_v57  ;;  %v3439_v51 = vpack.c.bf16 %v3652_v59, %v3651_v12  ;;  %v3459_v19 = vpack.c.bf16 %v2534_v53, %v2533_v18  ;;  %v3655_v11 = vpop.permute.xlu0 %3654 }
 0xc97   : > { %3420 = vmatprep.subr.bf16.mxu0 %v3419_v58  ;;  %v3657_v37 = vunpack.i.h.bf16 %v3655_v11 }
 0xc99   : > { %3174 = vmatmul.mubr.msk.f32.vlgmr.msra.gmra.mrb[6].mxu0 %vm840_vm0, %v1553_v60  ;;  %v2506_v34 = vsel %vm840_vm0, %v4507_v61, %v3657_v37 }
 0xc9a   : > { %3422 = vmatpush3.bf16.msra.mxu0 %v3419_v58  ;;  %3201 = vmatprep.mubr.msk.f32.mxu0 %vm840_vm0, %v1956_v21 }
 0xc9b   : > { %3440 = vmatprep.subr.bf16.mxu0 %v3439_v51 }
 0xc9d   : > { %3202 = vmatmul.mubr.msk.f32.vlgmr.msra.gmra.mrb[8].mxu0 %vm840_vm0, %v1957_v0 }
 0xc9e   : > { %3442 = vmatpush3.bf16.msra.mxu0 %v3439_v51  ;;  %3229 = vmatprep.mubr.msk.f32.mxu0 %vm840_vm0, %v2360_v3 }
 0xc9f   : > { %3444 = vmatprep.subr.bf16.mxu0 %v3443_v9 }
 0xca1   : > { %3230 = vmatmul.mubr.msk.f32.vlgmr.msra.gmra.mrb[10].mxu0 %vm840_vm0, %v2361_v1 }
 0xca2   : > { %3446 = vmatpush3.bf16.msra.mxu0 %v3443_v9 }
 0xca3   : > { %3448 = vmatprep.subr.bf16.mxu0 %v3447_v13 }
 0xca6   : > { %3450 = vmatpush3.bf16.msra.mxu0 %v3447_v13 }
 0xca7   : > { %3452 = vmatprep.subr.bf16.mxu0 %v3451_v54 }
 0xcaa   : > { %3454 = vmatpush3.bf16.msra.mxu0 %v3451_v54 }
 0xcab   : > { %3456 = vmatprep.subr.bf16.mxu0 %v3455_v17 }
 0xcae   : > { %3458 = vmatpush3.bf16.msra.mxu0 %v3455_v17 }
 0xcaf   : > { %3460 = vmatprep.subr.bf16.mxu0 %v3459_v19 }
 0xcb2   : > { %3462 = vmatpush3.bf16.msra.mxu0 %v3459_v19 }
 0xcb3   : > { %3464 = vmatprep.subr.bf16.mxu0 %v3463_v23 }
 0xcb6   : > { %3466 = vmatpush3.bf16.msra.mxu0 %v3463_v23 }
 0xcb7   : > { %3468 = vmatprep.subr.bf16.mxu0 %v3467_v26 }
 0xcba   : > { %3470 = vmatpush3.bf16.msra.mxu0 %v3467_v26 }
 0xcbb   : > { %3472 = vmatprep.subr.bf16.mxu0 %v3471_v32 }
 0xcbe   : > { %3474 = vmatpush3.bf16.msra.mxu0 %v3471_v32 }
 0xd68   : > { %v3161_v27 = vpop.f32.mrb[4].mxu0 }
 0xd69   : > { %v1430_v28 = vpop.f32.mrb[5].mxu0 }
 0xd6a   : > { %v3658_v29 = vpack.i.bf16 %v3161_v27, %v1430_v28 }
 0xd6c   : > { %3659 = vrot.lane.b32.xlu1 %v3658_v29, %s4047_s1  ;;  %v3175_v33 = vpop.f32.mrb[6].mxu0 }
 0xd6d   : > { %v1632_v35 = vpop.f32.mrb[7].mxu0 }
 0xd6e   : > { %v3663_v5 = vpack.i.bf16 %v3175_v33, %v1632_v35 }
 0xd70   : > { %3669 = vrot.lane.b32.xlu1 %v3668_v38, %s4046_s30  ;;  %3664 = vrot.lane.b32.xlu0 %v3663_v5, %s4048_s22  ;;  %v3203_v39 = vpop.f32.mrb[8].mxu0  ;;  %v3656_v38 = vunpack.i.l.bf16 %v3655_v11 }
 0xd71   : > { %v2036_v41 = vpop.f32.mrb[9].mxu0 }
 0xd72   : > { %v3673_v48 = vpack.i.bf16 %v3203_v39, %v2036_v41  ;;  %v2505_v40 = vsel %vm840_vm0, %v4509_v62, %v3656_v38 }
 0xd74   : > { %3679 = vrot.lane.b32.xlu1 %v3678_v43, %s4045_s12  ;;  %3674 = vrot.lane.b32.xlu0 %v3673_v48, %s4044_s8  ;;  %v3231_v49 = vpop.f32.mrb[10].mxu0 }
 0xd75   : > { %v2440_v50 = vpop.f32.mrb[11].mxu0 }
 0xd76   : > { %v3683_v42 = vpack.i.bf16 %v3231_v49, %v2440_v50 }
 0xd78   : > { %3684 = vrot.lane.b32.xlu0 %v3683_v42, %s4043_s3  ;;  %s3954_s3 = scalar_lea.vmem %s4732_s7, 256 }
 0xd79   : > { %p3955_p5 = scmp.ne.s32.totalorder %s4732_s7, %s3954_s3  ;;  %p3962_p7 = scmp.lt.s32.totalorder %s3960_s16, %s3954_s3 }
 0xd7b   : > { %p3956_p4 = pnand %p3955_p5, %p4863_p2  ;;  %p3963_p9 = por %p3962_p7, %p3961_p13 }
 0xd7d   : > { %p3957_p11 = pneg %p3956_p4 }
 0xd7f   : > { %p3964_p12 = pnand %p3963_p9, %p3957_p11 }
 0xdde   : > { %v3660_v36 = vpop.permute.xlu1 %3659 }
 0xddf   : > { %v3662_v44 = vunpack.i.h.bf16 %v3660_v36  ;;  %v3661_v45 = vunpack.i.l.bf16 %v3660_v36 }
 0xde1   : > { %v2509_v57 = vsel %vm2507_vm2, %v2506_v34, %v3662_v44  ;;  %v2508_v15 = vsel %vm2507_vm2, %v2505_v40, %v3661_v45 }
 0xde2   : > { %v3670_v46 = vpop.permute.xlu1 %3669  ;;  %v3665_v47 = vpop.permute.xlu0 %3664 }
 0xde3   : > { %v3667_v43 = vunpack.i.h.bf16 %v3665_v47  ;;  %v3666_v56 = vunpack.i.l.bf16 %v3665_v47  ;;  %v3672_v58 = vunpack.i.h.bf16 %v3670_v46  ;;  %v3671_v59 = vunpack.i.l.bf16 %v3670_v46 }
 0xde5   : > { %v2512_v12 = vsel %vm2510_vm3, %v2509_v57, %v3667_v43  ;;  %v2511_v60 = vsel %vm2510_vm3, %v2508_v15, %v3666_v56 }
 0xde6   : > { %v3680_v63 = vpop.permute.xlu1 %3679  ;;  %v3675_v21 = vpop.permute.xlu0 %3674  ;;  %v2515_v61 = vsel %vm2513_vm4, %v2512_v12, %v3672_v58  ;;  %v2514_v3 = vsel %vm2513_vm4, %v2511_v60, %v3671_v59 }
 0xde7   : > { %v3677_v55 = vunpack.i.h.bf16 %v3675_v21  ;;  %v3676_v51 = vunpack.i.l.bf16 %v3675_v21  ;;  %v3682_v0 = vunpack.i.h.bf16 %v3680_v63  ;;  %v3681_v2 = vunpack.i.l.bf16 %v3680_v63 }
 0xde9   : > { %v2518_v62 = vsel %vm2516_vm5, %v2515_v61, %v3677_v55  ;;  %v2517_v1 = vsel %vm2516_vm5, %v2514_v3, %v3676_v51 }
 0xdea   : > { %v3685_v4 = vpop.permute.xlu0 %3684  ;;  %v2520_v9 = vsel %vm2519_vm6, %v2517_v1, %v3681_v2  ;;  %v2521_v10 = vsel %vm2519_vm6, %v2518_v62, %v3682_v0 }
 0xdeb   : > { %v3687_v7 = vunpack.i.h.bf16 %v3685_v4  ;;  %v3686_v8 = vunpack.i.l.bf16 %v3685_v4 }
 0xded   : > { %v2523_v13 = vsel %vm2522_vm7, %v2520_v9, %v3686_v8  ;;  %v2524_v6 = vsel %vm2522_vm7, %v2521_v10, %v3687_v7 }
 0xdee   : > { %3264 = vmatprep.mubr.f32.mxu0 %v2523_v13 }
 0xdef   : > { %3265 = vmatmul.mubr.f32.vlgmr.msra.gmra.mrb[12].mxu0 %v2524_v6 }
 0xec2   : > { %v3266_v54 = vpop.f32.mrb[12].mxu0 }
 0xec3   : > { %v2620_v14 = vadd.f32 %v3266_v54, %v2869_v52  ;;  %v2614_v16 = vpop.f32.mrb[13].mxu0 }
 0xec4   : > { %v2615_v17 = vadd.f32 %v2869_v52, %v2614_v16 }
 0xec5   : > { %2624 = vst [vmem:[%s539_s15 + $0x8] sm:$0xff] %v2620_v14 }
 0xec6   : > { %2623 = vst [vmem:[%s539_s15] sm:$0xff] %v2615_v17 }
 0xec7   : > { %3967 = shalt.err (!%p3964_p12)
}
 0xec8   : > { %s3968_s14 = scalar_lea.hbm %s4737_s20, 256  ;;  %s3972_s30 = scalar_lea.hbm %s4862_s10, 512 }
 0xec9   : > { %p3969_p8 = scmp.ne.s32.totalorder %s4737_s20, %s3968_s14  ;;  %p3973_p1 = scmp.lt.u32.totalorder %s4737_s20, %s4862_s10 }
 0xeca   : > { %p3974_p6 = scmp.lt.u32.totalorder %s3972_s30, %s3968_s14  ;;  %p3976_p5 = scmp.lt.u32.totalorder %s3968_s14, %s4737_s20 }
 0xecb   : > { %p3970_p10 = pnand %p3969_p8, %p4863_p2 }
 0xecc   : > { %p3975_p3 = por %p3974_p6, %p3973_p1 }
 0xecd   : > { %p3971_p0 = pneg %p3970_p10 }
 0xece   : > { %p3977_p4 = por %p3976_p5, %p3975_p3 }
 0xed0   : > { %p3978_p11 = pnand %p3977_p4, %p3971_p0 }
 0xed2   : > { %3981 = shalt.err (!%p3978_p11)
}
 0xed3   : > { %s4051_s13 = smov 128   ;;  %s4052_s15 = smov 8  }
 0xed4   : > { %3497 = dma.vmem_to_hbm [thread:$0]  (%p4863_p2), %s4732_s7, 256, %s4737_s20, %s2626_s28, %s4051_s13, %s4051_s13, %s4052_s15  }
 0xed5 PF: > { %s4864_s25 = sld [smem:[#allocation20_spill]]  ;;  %s4865_s17 = sld [smem:[#allocation22_spill]] }
 0xed6   : > { %s4866_s26 = sld [smem:[#allocation21_spill]] }
 0xedb   : > { %s2654_s23 = sand.u32 1, %s4864_s25   ;;  %p4867_p13 = scmp.ne.s32.totalorder %s4865_s17, 0 }
 0xedc   : > { %p4868_p7 = scmp.ge.s32.totalorder %s4866_s26, 2  ;;  %s2655_s29 = scalar_lea.sflag [#allocation4], %s2654_s23 }
 0xede   : > { %p3523_p9 = pnand %p4868_p7, %p4867_p13 }
 0xee0   : > { %4015 = dma.done.wait (!%p3523_p9), %s2655_s29, 256  }
 0xee1   : > { %4017 = vsyncadd (!%p3523_p9), %s2655_s29, 4294967040  ;;  %s4869_s20 = sld [smem:[#allocation23_spill]]  ;;  %s4870_s24 = sld [smem:[#allocation25_spill]] }
 0xee2   : > { %s4871_s17 = smov %s4024_s18  ;;  %s4872_s18 = smov %s4028_s19 }
 0xee7   : > { %p29_p12 = scmp.ge.s32.totalorder %s4869_s20, 4   ;;  %s4873_s19 = smov %s4870_s24 }
 0xee9   :  { %31 = sbr.rel (!%p29_p12) target bundleno = 17 (0x11), region = 149 }
 0xef0   :  { %2660 = vsyncpa [#allocation3], 1 }
 0xef1   :  { %2662 = vsyncpa [#allocation3 + $0x1], 1 }
 0xef2   :  { %2663 = vsyncpa [#allocation6], 1 }
 0xef3   :  { %2665 = vsyncpa [#allocation6 + $0x1], 1 }
 0xef4   :  { %2666 = vsyncpa [#allocation9], 1 }
 0xef5   :  { %2667 = vsyncpa [#allocation12], 1 }
 0xef6   :  { %2668 = vsyncpa [#allocation4], 1 }
 0xef7   :  { %2670 = vsyncpa [#allocation4 + $0x1], 1 }

</bundles_post_ra>
